<compile_context>
chip_gen: v5e
topology: v5e:2x2
jax: 0.10.0
libtpu: 0.0.40
codegen_flags: <defaults>
</compile_context>

<pallas_src>
import functools

import jax
import jax.numpy as jnp
import numpy as np
from jax import lax
from jax.experimental import pallas as pl
from jax.experimental.pallas import tpu as pltpu


def _hot_refresh_contra_kernel(feat_ref, feat_old_ref, inv_old_row_ref,
                               inv_old_col_ref, tcol_ref, trow_ref,
                               loss_ref, *, topk):
    f32 = jnp.float32
    tm = feat_ref.shape[0]

    # Inverse row norms of this feat block (only O(tm*D) elementwise work).
    feat_f32 = feat_ref[...].astype(f32)                               # (tm, D)
    inv_feat = lax.rsqrt(
        jnp.maximum(jnp.sum(feat_f32 * feat_f32, axis=1, keepdims=True), 1e-24))

    # --- positive logits: <feat[i], feat_old[i]> using PRECOMPUTED old norms.
    start = pl.multiple_of(pl.program_id(0) * tm, tm)
    fo_rows = feat_old_ref[pl.ds(start, tm), :].astype(f32)            # (tm, D)
    pos = (jnp.sum(feat_f32 * fo_rows, axis=1, keepdims=True)
           * inv_feat * inv_old_col_ref[...])                          # (tm, 1)

    # --- negative logits: raw (tm, B) similarity straight from the DMA buffers
    # (bf16 inputs go buffer -> MXU with no cast / f32 copy), then fold both
    # normalizations in as cheap post-matmul scalings.
    sim = lax.dot_general(feat_ref[...], feat_old_ref[...],
                          dimension_numbers=(((1,), (1,)), ((), ())),
                          preferred_element_type=f32)                  # (tm, B)
    sim = sim * inv_feat * inv_old_row_ref[...].astype(f32)

    mask = tcol_ref[...] == trow_ref[...]                              # (tm, B) bool
    working = jnp.where(mask, jnp.float32(-1e9), sim)                  # single select

    # --- fused top-k + CE(label=0): read-only masked-max selection.
    # One cross-lane max per k; `working` is never rewritten; the first max
    # doubles as the logsumexp shift `m`.
    cur = jnp.max(working, axis=1, keepdims=True)                      # top-1 neg
    m = jnp.maximum(pos, cur)                                          # max over logits
    sumexp = jnp.exp(pos - m) + jnp.exp(cur - m)
    for _ in range(topk - 1):
        cur = jnp.max(jnp.where(working < cur, working, -jnp.inf),
                      axis=1, keepdims=True)
        sumexp = sumexp + jnp.exp(cur - m)                             # exp(-inf)=0 if exhausted

    # CE with target index 0: loss_i = logsumexp(logits_i) - pos_i
    loss_ref[...] = jnp.log(sumexp) + m - pos                          # (tm, 1)


def _vmem_capacity_bytes():
    try:
        return int(pltpu.get_tpu_info().vmem_capacity_bytes)
    except Exception:
        return 64 << 20   # conservative (v7x-sized) fallback


def _vmem_estimate_bytes(B, D, tm, in_itemsize):
    # Streamed, double-buffered blocks: feat (tm,D) + tcol/inv_old_col/out (tm,1).
    streamed = 2 * (tm * D * in_itemsize + 3 * tm * 4)
    # Grid-invariant residents (pipeline still double-buffers them):
    # feat_old (B,D) in its native dtype, trow (1,B) i32, inv_old_row (1,B) f32.
    resident = 2 * (B * D * in_itemsize + 2 * B * 4)
    # In-kernel f32 temporaries: feat_f32 + fo_rows (tm,D each), ~4 live (tm,B)
    # f32 values (sim, working, select temp, pipeline-overlap copy) + bool mask.
    temps = 4 * (2 * tm * D) + 4 * (4 * tm * B) + tm * B
    return streamed + resident + temps


def _pick_block_rows(B, D, in_itemsize, budget_bytes):
    candidates = [tm for tm in (1024, 512, 256, 128, 64, 32, 16, 8)
                  if tm <= B and B % tm == 0]
    for tm in candidates:
        if _vmem_estimate_bytes(B, D, tm, in_itemsize) <= budget_bytes:
            return tm
    return candidates[-1] if candidates else B


def hot_refresh_loss_contra(feat, feat_old, targets, *, topk_neg,
                            loss_weight=1.0, block_rows=None):
    """Pallas forward of HotRefreshLoss(loss_type='contra', gather_all=False)."""
    B, D = feat.shape
    assert feat_old.shape == (B, D)
    assert 0 < topk_neg <= B, "topk_neg must be in (0, B]"

    f32 = jnp.float32
    in_itemsize = jnp.dtype(feat.dtype).itemsize

    # Generation-aware VMEM budgeting (128 MiB v5e/v6e vs 64 MiB v7x).
    capacity = _vmem_capacity_bytes()
    budget = int(np.clip(capacity // 2 - (8 << 20), 16 << 20, 56 << 20))
    if block_rows is None:
        block_rows = _pick_block_rows(B, D, in_itemsize, budget)
    assert B % block_rows == 0, "block_rows must divide the batch size"
    num_blocks = B // block_rows

    # Precompute feat_old inverse row norms ONCE (kernel consumes raw feat_old).
    fo32 = feat_old.astype(f32)
    inv_old = lax.rsqrt(jnp.maximum(jnp.sum(fo32 * fo32, axis=1), 1e-24))   # (B,)
    inv_old_row = inv_old.reshape(1, B)
    inv_old_col = inv_old.reshape(B, 1)

    tcol = targets.reshape(B, 1).astype(jnp.int32)
    trow = targets.reshape(1, B).astype(jnp.int32)

    est = _vmem_estimate_bytes(B, D, block_rows, in_itemsize)
    vmem_limit = int(np.clip(int(1.5 * est), 16 << 20, capacity // 2))

    kernel = functools.partial(_hot_refresh_contra_kernel, topk=topk_neg)

    per_row = pl.pallas_call(
        kernel,
        out_shape=jax.ShapeDtypeStruct((B, 1), jnp.float32),
        grid_spec=pltpu.PrefetchScalarGridSpec(
            num_scalar_prefetch=0,
            grid=(num_blocks,),
            in_specs=[
                pl.BlockSpec((block_rows, D), lambda i: (i, 0)),   # feat row block (raw dtype)
                pl.BlockSpec((B, D), lambda i: (0, 0)),            # feat_old (resident, raw dtype)
                pl.BlockSpec((1, B), lambda i: (0, 0)),            # inv_old, row form (resident)
                pl.BlockSpec((block_rows, 1), lambda i: (i, 0)),   # inv_old, column slice
                pl.BlockSpec((block_rows, 1), lambda i: (i, 0)),   # targets, column form
                pl.BlockSpec((1, B), lambda i: (0, 0)),            # targets, row form (resident)
            ],
            out_specs=pl.BlockSpec((block_rows, 1), lambda i: (i, 0)),
        ),
        compiler_params=pltpu.CompilerParams(
            dimension_semantics=("parallel",),
            vmem_limit_bytes=vmem_limit,
        ),
    )(feat, feat_old, inv_old_row, inv_old_col, tcol, trow)

    return jnp.sum(per_row) * (loss_weight / B)


def _reference_numpy(feat, feat_old, targets, topk_neg, loss_weight=1.0):
    """Float64 host reference of the 'contra' branch (CrossEntropy mean)."""
    f = np.asarray(feat, dtype=np.float64)
    fo = np.asarray(feat_old, dtype=np.float64)
    t = np.asarray(targets)
    f = f / np.maximum(np.linalg.norm(f, axis=1, keepdims=True), 1e-12)
    fo = fo / np.maximum(np.linalg.norm(fo, axis=1, keepdims=True), 1e-12)
    pos = np.sum(f * fo, axis=1, keepdims=True)
    masks = (t[:, None] == t[None, :]).astype(np.float64)
    neg = f @ fo.T - masks * 1e9
    neg_topk = -np.sort(-neg, axis=1)[:, :topk_neg]
    logits = np.concatenate([pos, neg_topk], axis=1)
    m = logits.max(axis=1, keepdims=True)
    logz = np.log(np.sum(np.exp(logits - m), axis=1)) + m[:, 0]
    return np.mean(logz - logits[:, 0]) * loss_weight


if __name__ == "__main__":
    # Module defaults: topk_neg=30, loss_weight=1.0; temp is unused in the
    # 'contra' branch ("logits_all /= 1").  Small deterministic shapes.
    B, D = 64, 32
    TOPK_NEG = 30
    LOSS_WEIGHT = 1.0

    key = jax.random.PRNGKey(0)
    k1, k2, k3 = jax.random.split(key, 3)
    feat = jax.random.normal(k1, (B, D), dtype=jnp.float32)
    feat_old = jax.random.normal(k2, (B, D), dtype=jnp.float32)
    targets = jax.random.randint(k3, (B,), 0, 4, dtype=jnp.int32)

    loss = hot_refresh_loss_contra(feat, feat_old, targets,
                                   topk_neg=TOPK_NEG, loss_weight=LOSS_WEIGHT,
                                   block_rows=32)   # 2 row blocks: exercises the grid
    loss = jax.block_until_ready(loss)

    ref = _reference_numpy(np.asarray(feat), np.asarray(feat_old),
                           np.asarray(targets), TOPK_NEG, LOSS_WEIGHT)
    assert np.allclose(np.asarray(loss), ref, rtol=1e-3, atol=2e-3), \
        (float(loss), float(ref))

    print("KERNEL_OK")
</pallas_src>

<mosaic_0001>
module attributes {stable_mosaic.version = 11 : i64} {
  func.func @_hot_refresh_contra_kernel(%arg0: i32, %arg1: memref<32x32xf32, #tpu.memory_space<vmem>>, %arg2: memref<64x32xf32, #tpu.memory_space<vmem>>, %arg3: memref<1x64xf32, #tpu.memory_space<vmem>>, %arg4: memref<32x1xf32, #tpu.memory_space<vmem>>, %arg5: memref<32x1xi32, #tpu.memory_space<vmem>>, %arg6: memref<1x64xi32, #tpu.memory_space<vmem>>, %arg7: memref<32x1xf32, #tpu.memory_space<vmem>>) attributes {dimension_semantics = [#tpu.dimension_semantics<parallel>], iteration_bounds = array<i64: 2>, scalar_prefetch = 0 : i64, scratch_operands = 0 : i64, tpu.core_type = #tpu.core_type<tc>, window_params = [{transform_indices = @transform_0, window_bounds = array<i64: 32, 32>}, {pipeline_mode = #tpu.pipeline_mode<synchronous>, transform_indices = @transform_1, window_bounds = array<i64: 64, 32>}, {pipeline_mode = #tpu.pipeline_mode<synchronous>, transform_indices = @transform_2, window_bounds = array<i64: 1, 64>}, {transform_indices = @transform_3, window_bounds = array<i64: 32, 1>}, {transform_indices = @transform_4, window_bounds = array<i64: 32, 1>}, {pipeline_mode = #tpu.pipeline_mode<synchronous>, transform_indices = @transform_5, window_bounds = array<i64: 1, 64>}, {transform_indices = @transform_6, window_bounds = array<i64: 32, 1>}]} {
    %c0 = arith.constant 0 : index
    %c0_0 = arith.constant 0 : index
    %0 = vector.load %arg1[%c0, %c0_0] : memref<32x32xf32, #tpu.memory_space<vmem>>, vector<32x32xf32>
    %1 = arith.mulf %0, %0 : vector<32x32xf32>
    %cst = arith.constant dense<0.000000e+00> : vector<32xf32>
    %2 = vector.multi_reduction <add>, %1, %cst [1] : vector<32x32xf32> to vector<32xf32>
    %3 = vector.shape_cast %2 : vector<32xf32> to vector<32x1xf32>
    %cst_1 = arith.constant 1.000000e-24 : f32
    %4 = vector.broadcast %cst_1 : f32 to vector<32x1xf32>
    %5 = arith.maximumf %3, %4 : vector<32x1xf32>
    %6 = math.rsqrt %5 : vector<32x1xf32>
    %c32_i32 = arith.constant 32 : i32
    %7 = arith.muli %arg0, %c32_i32 : i32
    %8 = tpu.assume_multiple %7, 32 : i32
    %9 = arith.index_cast %8 : i32 to index
    %c0_2 = arith.constant 0 : index
    %10 = vector.load %arg2[%9, %c0_2] : memref<64x32xf32, #tpu.memory_space<vmem>>, vector<32x32xf32>
    %11 = arith.mulf %0, %10 : vector<32x32xf32>
    %cst_3 = arith.constant dense<0.000000e+00> : vector<32xf32>
    %12 = vector.multi_reduction <add>, %11, %cst_3 [1] : vector<32x32xf32> to vector<32xf32>
    %13 = vector.shape_cast %12 : vector<32xf32> to vector<32x1xf32>
    %14 = arith.mulf %13, %6 : vector<32x1xf32>
    %c0_4 = arith.constant 0 : index
    %c0_5 = arith.constant 0 : index
    %15 = vector.load %arg4[%c0_4, %c0_5] : memref<32x1xf32, #tpu.memory_space<vmem>>, vector<32x1xf32>
    %16 = arith.mulf %14, %15 : vector<32x1xf32>
    %c0_6 = arith.constant 0 : index
    %c0_7 = arith.constant 0 : index
    %17 = vector.load %arg1[%c0_6, %c0_7] : memref<32x32xf32, #tpu.memory_space<vmem>>, vector<32x32xf32>
    %c0_8 = arith.constant 0 : index
    %c0_9 = arith.constant 0 : index
    %18 = vector.load %arg2[%c0_8, %c0_9] : memref<64x32xf32, #tpu.memory_space<vmem>>, vector<64x32xf32>
    %cst_10 = arith.constant dense<0.000000e+00> : vector<32x64xf32>
    %19 = tpu.matmul %17, %18, %cst_10 {dimension_numbers = #tpu.dot_dimension_numbers<[1], [1], [0], [0], [0, 0, 1, 0], [], []>} : vector<32x32xf32>, vector<64x32xf32>, vector<32x64xf32> -> vector<32x64xf32>
    %20 = vector.broadcast %6 : vector<32x1xf32> to vector<32x64xf32>
    %21 = arith.mulf %19, %20 : vector<32x64xf32>
    %c0_11 = arith.constant 0 : index
    %c0_12 = arith.constant 0 : index
    %22 = vector.load %arg3[%c0_11, %c0_12] : memref<1x64xf32, #tpu.memory_space<vmem>>, vector<1x64xf32>
    %23 = vector.broadcast %22 : vector<1x64xf32> to vector<32x64xf32>
    %24 = arith.mulf %21, %23 : vector<32x64xf32>
    %c0_13 = arith.constant 0 : index
    %c0_14 = arith.constant 0 : index
    %25 = vector.load %arg5[%c0_13, %c0_14] : memref<32x1xi32, #tpu.memory_space<vmem>>, vector<32x1xi32>
    %c0_15 = arith.constant 0 : index
    %c0_16 = arith.constant 0 : index
    %26 = vector.load %arg6[%c0_15, %c0_16] : memref<1x64xi32, #tpu.memory_space<vmem>>, vector<1x64xi32>
    %27 = vector.broadcast %25 : vector<32x1xi32> to vector<32x64xi32>
    %28 = vector.broadcast %26 : vector<1x64xi32> to vector<32x64xi32>
    %29 = arith.cmpi eq, %27, %28 : vector<32x64xi32>
    %cst_17 = arith.constant -1.000000e+09 : f32
    %30 = vector.broadcast %cst_17 : f32 to vector<32x64xf32>
    %31 = arith.select %29, %30, %24 : vector<32x64xi1>, vector<32x64xf32>
    %cst_18 = arith.constant dense<0xFF800000> : vector<32xf32>
    %32 = vector.multi_reduction <maximumf>, %31, %cst_18 [1] : vector<32x64xf32> to vector<32xf32>
    %33 = vector.shape_cast %32 : vector<32xf32> to vector<32x1xf32>
    %34 = arith.maximumf %16, %33 : vector<32x1xf32>
    %35 = arith.subf %16, %34 : vector<32x1xf32>
    %36 = math.exp %35 : vector<32x1xf32>
    %37 = arith.subf %33, %34 : vector<32x1xf32>
    %38 = math.exp %37 : vector<32x1xf32>
    %39 = arith.addf %36, %38 : vector<32x1xf32>
    %40 = vector.broadcast %33 : vector<32x1xf32> to vector<32x64xf32>
    %41 = arith.cmpf olt, %31, %40 : vector<32x64xf32>
    %cst_19 = arith.constant 0xFF800000 : f32
    %42 = vector.broadcast %cst_19 : f32 to vector<32x64xf32>
    %43 = arith.select %41, %31, %42 : vector<32x64xi1>, vector<32x64xf32>
    %cst_20 = arith.constant dense<0xFF800000> : vector<32xf32>
    %44 = vector.multi_reduction <maximumf>, %43, %cst_20 [1] : vector<32x64xf32> to vector<32xf32>
    %45 = vector.shape_cast %44 : vector<32xf32> to vector<32x1xf32>
    %46 = arith.subf %45, %34 : vector<32x1xf32>
    %47 = math.exp %46 : vector<32x1xf32>
    %48 = arith.addf %39, %47 : vector<32x1xf32>
    %49 = vector.broadcast %45 : vector<32x1xf32> to vector<32x64xf32>
    %50 = arith.cmpf olt, %31, %49 : vector<32x64xf32>
    %cst_21 = arith.constant 0xFF800000 : f32
    %51 = vector.broadcast %cst_21 : f32 to vector<32x64xf32>
    %52 = arith.select %50, %31, %51 : vector<32x64xi1>, vector<32x64xf32>
    %cst_22 = arith.constant dense<0xFF800000> : vector<32xf32>
    %53 = vector.multi_reduction <maximumf>, %52, %cst_22 [1] : vector<32x64xf32> to vector<32xf32>
    %54 = vector.shape_cast %53 : vector<32xf32> to vector<32x1xf32>
    %55 = arith.subf %54, %34 : vector<32x1xf32>
    %56 = math.exp %55 : vector<32x1xf32>
    %57 = arith.addf %48, %56 : vector<32x1xf32>
    %58 = vector.broadcast %54 : vector<32x1xf32> to vector<32x64xf32>
    %59 = arith.cmpf olt, %31, %58 : vector<32x64xf32>
    %cst_23 = arith.constant 0xFF800000 : f32
    %60 = vector.broadcast %cst_23 : f32 to vector<32x64xf32>
    %61 = arith.select %59, %31, %60 : vector<32x64xi1>, vector<32x64xf32>
    %cst_24 = arith.constant dense<0xFF800000> : vector<32xf32>
    %62 = vector.multi_reduction <maximumf>, %61, %cst_24 [1] : vector<32x64xf32> to vector<32xf32>
    %63 = vector.shape_cast %62 : vector<32xf32> to vector<32x1xf32>
    %64 = arith.subf %63, %34 : vector<32x1xf32>
    %65 = math.exp %64 : vector<32x1xf32>
    %66 = arith.addf %57, %65 : vector<32x1xf32>
    %67 = vector.broadcast %63 : vector<32x1xf32> to vector<32x64xf32>
    %68 = arith.cmpf olt, %31, %67 : vector<32x64xf32>
    %cst_25 = arith.constant 0xFF800000 : f32
    %69 = vector.broadcast %cst_25 : f32 to vector<32x64xf32>
    %70 = arith.select %68, %31, %69 : vector<32x64xi1>, vector<32x64xf32>
    %cst_26 = arith.constant dense<0xFF800000> : vector<32xf32>
    %71 = vector.multi_reduction <maximumf>, %70, %cst_26 [1] : vector<32x64xf32> to vector<32xf32>
    %72 = vector.shape_cast %71 : vector<32xf32> to vector<32x1xf32>
    %73 = arith.subf %72, %34 : vector<32x1xf32>
    %74 = math.exp %73 : vector<32x1xf32>
    %75 = arith.addf %66, %74 : vector<32x1xf32>
    %76 = vector.broadcast %72 : vector<32x1xf32> to vector<32x64xf32>
    %77 = arith.cmpf olt, %31, %76 : vector<32x64xf32>
    %cst_27 = arith.constant 0xFF800000 : f32
    %78 = vector.broadcast %cst_27 : f32 to vector<32x64xf32>
    %79 = arith.select %77, %31, %78 : vector<32x64xi1>, vector<32x64xf32>
    %cst_28 = arith.constant dense<0xFF800000> : vector<32xf32>
    %80 = vector.multi_reduction <maximumf>, %79, %cst_28 [1] : vector<32x64xf32> to vector<32xf32>
    %81 = vector.shape_cast %80 : vector<32xf32> to vector<32x1xf32>
    %82 = arith.subf %81, %34 : vector<32x1xf32>
    %83 = math.exp %82 : vector<32x1xf32>
    %84 = arith.addf %75, %83 : vector<32x1xf32>
    %85 = vector.broadcast %81 : vector<32x1xf32> to vector<32x64xf32>
    %86 = arith.cmpf olt, %31, %85 : vector<32x64xf32>
    %cst_29 = arith.constant 0xFF800000 : f32
    %87 = vector.broadcast %cst_29 : f32 to vector<32x64xf32>
    %88 = arith.select %86, %31, %87 : vector<32x64xi1>, vector<32x64xf32>
    %cst_30 = arith.constant dense<0xFF800000> : vector<32xf32>
    %89 = vector.multi_reduction <maximumf>, %88, %cst_30 [1] : vector<32x64xf32> to vector<32xf32>
    %90 = vector.shape_cast %89 : vector<32xf32> to vector<32x1xf32>
    %91 = arith.subf %90, %34 : vector<32x1xf32>
    %92 = math.exp %91 : vector<32x1xf32>
    %93 = arith.addf %84, %92 : vector<32x1xf32>
    %94 = vector.broadcast %90 : vector<32x1xf32> to vector<32x64xf32>
    %95 = arith.cmpf olt, %31, %94 : vector<32x64xf32>
    %cst_31 = arith.constant 0xFF800000 : f32
    %96 = vector.broadcast %cst_31 : f32 to vector<32x64xf32>
    %97 = arith.select %95, %31, %96 : vector<32x64xi1>, vector<32x64xf32>
    %cst_32 = arith.constant dense<0xFF800000> : vector<32xf32>
    %98 = vector.multi_reduction <maximumf>, %97, %cst_32 [1] : vector<32x64xf32> to vector<32xf32>
    %99 = vector.shape_cast %98 : vector<32xf32> to vector<32x1xf32>
    %100 = arith.subf %99, %34 : vector<32x1xf32>
    %101 = math.exp %100 : vector<32x1xf32>
    %102 = arith.addf %93, %101 : vector<32x1xf32>
    %103 = vector.broadcast %99 : vector<32x1xf32> to vector<32x64xf32>
    %104 = arith.cmpf olt, %31, %103 : vector<32x64xf32>
    %cst_33 = arith.constant 0xFF800000 : f32
    %105 = vector.broadcast %cst_33 : f32 to vector<32x64xf32>
    %106 = arith.select %104, %31, %105 : vector<32x64xi1>, vector<32x64xf32>
    %cst_34 = arith.constant dense<0xFF800000> : vector<32xf32>
    %107 = vector.multi_reduction <maximumf>, %106, %cst_34 [1] : vector<32x64xf32> to vector<32xf32>
    %108 = vector.shape_cast %107 : vector<32xf32> to vector<32x1xf32>
    %109 = arith.subf %108, %34 : vector<32x1xf32>
    %110 = math.exp %109 : vector<32x1xf32>
    %111 = arith.addf %102, %110 : vector<32x1xf32>
    %112 = vector.broadcast %108 : vector<32x1xf32> to vector<32x64xf32>
    %113 = arith.cmpf olt, %31, %112 : vector<32x64xf32>
    %cst_35 = arith.constant 0xFF800000 : f32
    %114 = vector.broadcast %cst_35 : f32 to vector<32x64xf32>
    %115 = arith.select %113, %31, %114 : vector<32x64xi1>, vector<32x64xf32>
    %cst_36 = arith.constant dense<0xFF800000> : vector<32xf32>
    %116 = vector.multi_reduction <maximumf>, %115, %cst_36 [1] : vector<32x64xf32> to vector<32xf32>
    %117 = vector.shape_cast %116 : vector<32xf32> to vector<32x1xf32>
    %118 = arith.subf %117, %34 : vector<32x1xf32>
    %119 = math.exp %118 : vector<32x1xf32>
    %120 = arith.addf %111, %119 : vector<32x1xf32>
    %121 = vector.broadcast %117 : vector<32x1xf32> to vector<32x64xf32>
    %122 = arith.cmpf olt, %31, %121 : vector<32x64xf32>
    %cst_37 = arith.constant 0xFF800000 : f32
    %123 = vector.broadcast %cst_37 : f32 to vector<32x64xf32>
    %124 = arith.select %122, %31, %123 : vector<32x64xi1>, vector<32x64xf32>
    %cst_38 = arith.constant dense<0xFF800000> : vector<32xf32>
    %125 = vector.multi_reduction <maximumf>, %124, %cst_38 [1] : vector<32x64xf32> to vector<32xf32>
    %126 = vector.shape_cast %125 : vector<32xf32> to vector<32x1xf32>
    %127 = arith.subf %126, %34 : vector<32x1xf32>
    %128 = math.exp %127 : vector<32x1xf32>
    %129 = arith.addf %120, %128 : vector<32x1xf32>
    %130 = vector.broadcast %126 : vector<32x1xf32> to vector<32x64xf32>
    %131 = arith.cmpf olt, %31, %130 : vector<32x64xf32>
    %cst_39 = arith.constant 0xFF800000 : f32
    %132 = vector.broadcast %cst_39 : f32 to vector<32x64xf32>
    %133 = arith.select %131, %31, %132 : vector<32x64xi1>, vector<32x64xf32>
    %cst_40 = arith.constant dense<0xFF800000> : vector<32xf32>
    %134 = vector.multi_reduction <maximumf>, %133, %cst_40 [1] : vector<32x64xf32> to vector<32xf32>
    %135 = vector.shape_cast %134 : vector<32xf32> to vector<32x1xf32>
    %136 = arith.subf %135, %34 : vector<32x1xf32>
    %137 = math.exp %136 : vector<32x1xf32>
    %138 = arith.addf %129, %137 : vector<32x1xf32>
    %139 = vector.broadcast %135 : vector<32x1xf32> to vector<32x64xf32>
    %140 = arith.cmpf olt, %31, %139 : vector<32x64xf32>
    %cst_41 = arith.constant 0xFF800000 : f32
    %141 = vector.broadcast %cst_41 : f32 to vector<32x64xf32>
    %142 = arith.select %140, %31, %141 : vector<32x64xi1>, vector<32x64xf32>
    %cst_42 = arith.constant dense<0xFF800000> : vector<32xf32>
    %143 = vector.multi_reduction <maximumf>, %142, %cst_42 [1] : vector<32x64xf32> to vector<32xf32>
    %144 = vector.shape_cast %143 : vector<32xf32> to vector<32x1xf32>
    %145 = arith.subf %144, %34 : vector<32x1xf32>
    %146 = math.exp %145 : vector<32x1xf32>
    %147 = arith.addf %138, %146 : vector<32x1xf32>
    %148 = vector.broadcast %144 : vector<32x1xf32> to vector<32x64xf32>
    %149 = arith.cmpf olt, %31, %148 : vector<32x64xf32>
    %cst_43 = arith.constant 0xFF800000 : f32
    %150 = vector.broadcast %cst_43 : f32 to vector<32x64xf32>
    %151 = arith.select %149, %31, %150 : vector<32x64xi1>, vector<32x64xf32>
    %cst_44 = arith.constant dense<0xFF800000> : vector<32xf32>
    %152 = vector.multi_reduction <maximumf>, %151, %cst_44 [1] : vector<32x64xf32> to vector<32xf32>
    %153 = vector.shape_cast %152 : vector<32xf32> to vector<32x1xf32>
    %154 = arith.subf %153, %34 : vector<32x1xf32>
    %155 = math.exp %154 : vector<32x1xf32>
    %156 = arith.addf %147, %155 : vector<32x1xf32>
    %157 = vector.broadcast %153 : vector<32x1xf32> to vector<32x64xf32>
    %158 = arith.cmpf olt, %31, %157 : vector<32x64xf32>
    %cst_45 = arith.constant 0xFF800000 : f32
    %159 = vector.broadcast %cst_45 : f32 to vector<32x64xf32>
    %160 = arith.select %158, %31, %159 : vector<32x64xi1>, vector<32x64xf32>
    %cst_46 = arith.constant dense<0xFF800000> : vector<32xf32>
    %161 = vector.multi_reduction <maximumf>, %160, %cst_46 [1] : vector<32x64xf32> to vector<32xf32>
    %162 = vector.shape_cast %161 : vector<32xf32> to vector<32x1xf32>
    %163 = arith.subf %162, %34 : vector<32x1xf32>
    %164 = math.exp %163 : vector<32x1xf32>
    %165 = arith.addf %156, %164 : vector<32x1xf32>
    %166 = vector.broadcast %162 : vector<32x1xf32> to vector<32x64xf32>
    %167 = arith.cmpf olt, %31, %166 : vector<32x64xf32>
    %cst_47 = arith.constant 0xFF800000 : f32
    %168 = vector.broadcast %cst_47 : f32 to vector<32x64xf32>
    %169 = arith.select %167, %31, %168 : vector<32x64xi1>, vector<32x64xf32>
    %cst_48 = arith.constant dense<0xFF800000> : vector<32xf32>
    %170 = vector.multi_reduction <maximumf>, %169, %cst_48 [1] : vector<32x64xf32> to vector<32xf32>
    %171 = vector.shape_cast %170 : vector<32xf32> to vector<32x1xf32>
    %172 = arith.subf %171, %34 : vector<32x1xf32>
    %173 = math.exp %172 : vector<32x1xf32>
    %174 = arith.addf %165, %173 : vector<32x1xf32>
    %175 = vector.broadcast %171 : vector<32x1xf32> to vector<32x64xf32>
    %176 = arith.cmpf olt, %31, %175 : vector<32x64xf32>
    %cst_49 = arith.constant 0xFF800000 : f32
    %177 = vector.broadcast %cst_49 : f32 to vector<32x64xf32>
    %178 = arith.select %176, %31, %177 : vector<32x64xi1>, vector<32x64xf32>
    %cst_50 = arith.constant dense<0xFF800000> : vector<32xf32>
    %179 = vector.multi_reduction <maximumf>, %178, %cst_50 [1] : vector<32x64xf32> to vector<32xf32>
    %180 = vector.shape_cast %179 : vector<32xf32> to vector<32x1xf32>
    %181 = arith.subf %180, %34 : vector<32x1xf32>
    %182 = math.exp %181 : vector<32x1xf32>
    %183 = arith.addf %174, %182 : vector<32x1xf32>
    %184 = vector.broadcast %180 : vector<32x1xf32> to vector<32x64xf32>
    %185 = arith.cmpf olt, %31, %184 : vector<32x64xf32>
    %cst_51 = arith.constant 0xFF800000 : f32
    %186 = vector.broadcast %cst_51 : f32 to vector<32x64xf32>
    %187 = arith.select %185, %31, %186 : vector<32x64xi1>, vector<32x64xf32>
    %cst_52 = arith.constant dense<0xFF800000> : vector<32xf32>
    %188 = vector.multi_reduction <maximumf>, %187, %cst_52 [1] : vector<32x64xf32> to vector<32xf32>
    %189 = vector.shape_cast %188 : vector<32xf32> to vector<32x1xf32>
    %190 = arith.subf %189, %34 : vector<32x1xf32>
    %191 = math.exp %190 : vector<32x1xf32>
    %192 = arith.addf %183, %191 : vector<32x1xf32>
    %193 = vector.broadcast %189 : vector<32x1xf32> to vector<32x64xf32>
    %194 = arith.cmpf olt, %31, %193 : vector<32x64xf32>
    %cst_53 = arith.constant 0xFF800000 : f32
    %195 = vector.broadcast %cst_53 : f32 to vector<32x64xf32>
    %196 = arith.select %194, %31, %195 : vector<32x64xi1>, vector<32x64xf32>
    %cst_54 = arith.constant dense<0xFF800000> : vector<32xf32>
    %197 = vector.multi_reduction <maximumf>, %196, %cst_54 [1] : vector<32x64xf32> to vector<32xf32>
    %198 = vector.shape_cast %197 : vector<32xf32> to vector<32x1xf32>
    %199 = arith.subf %198, %34 : vector<32x1xf32>
    %200 = math.exp %199 : vector<32x1xf32>
    %201 = arith.addf %192, %200 : vector<32x1xf32>
    %202 = vector.broadcast %198 : vector<32x1xf32> to vector<32x64xf32>
    %203 = arith.cmpf olt, %31, %202 : vector<32x64xf32>
    %cst_55 = arith.constant 0xFF800000 : f32
    %204 = vector.broadcast %cst_55 : f32 to vector<32x64xf32>
    %205 = arith.select %203, %31, %204 : vector<32x64xi1>, vector<32x64xf32>
    %cst_56 = arith.constant dense<0xFF800000> : vector<32xf32>
    %206 = vector.multi_reduction <maximumf>, %205, %cst_56 [1] : vector<32x64xf32> to vector<32xf32>
    %207 = vector.shape_cast %206 : vector<32xf32> to vector<32x1xf32>
    %208 = arith.subf %207, %34 : vector<32x1xf32>
    %209 = math.exp %208 : vector<32x1xf32>
    %210 = arith.addf %201, %209 : vector<32x1xf32>
    %211 = vector.broadcast %207 : vector<32x1xf32> to vector<32x64xf32>
    %212 = arith.cmpf olt, %31, %211 : vector<32x64xf32>
    %cst_57 = arith.constant 0xFF800000 : f32
    %213 = vector.broadcast %cst_57 : f32 to vector<32x64xf32>
    %214 = arith.select %212, %31, %213 : vector<32x64xi1>, vector<32x64xf32>
    %cst_58 = arith.constant dense<0xFF800000> : vector<32xf32>
    %215 = vector.multi_reduction <maximumf>, %214, %cst_58 [1] : vector<32x64xf32> to vector<32xf32>
    %216 = vector.shape_cast %215 : vector<32xf32> to vector<32x1xf32>
    %217 = arith.subf %216, %34 : vector<32x1xf32>
    %218 = math.exp %217 : vector<32x1xf32>
    %219 = arith.addf %210, %218 : vector<32x1xf32>
    %220 = vector.broadcast %216 : vector<32x1xf32> to vector<32x64xf32>
    %221 = arith.cmpf olt, %31, %220 : vector<32x64xf32>
    %cst_59 = arith.constant 0xFF800000 : f32
    %222 = vector.broadcast %cst_59 : f32 to vector<32x64xf32>
    %223 = arith.select %221, %31, %222 : vector<32x64xi1>, vector<32x64xf32>
    %cst_60 = arith.constant dense<0xFF800000> : vector<32xf32>
    %224 = vector.multi_reduction <maximumf>, %223, %cst_60 [1] : vector<32x64xf32> to vector<32xf32>
    %225 = vector.shape_cast %224 : vector<32xf32> to vector<32x1xf32>
    %226 = arith.subf %225, %34 : vector<32x1xf32>
    %227 = math.exp %226 : vector<32x1xf32>
    %228 = arith.addf %219, %227 : vector<32x1xf32>
    %229 = vector.broadcast %225 : vector<32x1xf32> to vector<32x64xf32>
    %230 = arith.cmpf olt, %31, %229 : vector<32x64xf32>
    %cst_61 = arith.constant 0xFF800000 : f32
    %231 = vector.broadcast %cst_61 : f32 to vector<32x64xf32>
    %232 = arith.select %230, %31, %231 : vector<32x64xi1>, vector<32x64xf32>
    %cst_62 = arith.constant dense<0xFF800000> : vector<32xf32>
    %233 = vector.multi_reduction <maximumf>, %232, %cst_62 [1] : vector<32x64xf32> to vector<32xf32>
    %234 = vector.shape_cast %233 : vector<32xf32> to vector<32x1xf32>
    %235 = arith.subf %234, %34 : vector<32x1xf32>
    %236 = math.exp %235 : vector<32x1xf32>
    %237 = arith.addf %228, %236 : vector<32x1xf32>
    %238 = vector.broadcast %234 : vector<32x1xf32> to vector<32x64xf32>
    %239 = arith.cmpf olt, %31, %238 : vector<32x64xf32>
    %cst_63 = arith.constant 0xFF800000 : f32
    %240 = vector.broadcast %cst_63 : f32 to vector<32x64xf32>
    %241 = arith.select %239, %31, %240 : vector<32x64xi1>, vector<32x64xf32>
    %cst_64 = arith.constant dense<0xFF800000> : vector<32xf32>
    %242 = vector.multi_reduction <maximumf>, %241, %cst_64 [1] : vector<32x64xf32> to vector<32xf32>
    %243 = vector.shape_cast %242 : vector<32xf32> to vector<32x1xf32>
    %244 = arith.subf %243, %34 : vector<32x1xf32>
    %245 = math.exp %244 : vector<32x1xf32>
    %246 = arith.addf %237, %245 : vector<32x1xf32>
    %247 = vector.broadcast %243 : vector<32x1xf32> to vector<32x64xf32>
    %248 = arith.cmpf olt, %31, %247 : vector<32x64xf32>
    %cst_65 = arith.constant 0xFF800000 : f32
    %249 = vector.broadcast %cst_65 : f32 to vector<32x64xf32>
    %250 = arith.select %248, %31, %249 : vector<32x64xi1>, vector<32x64xf32>
    %cst_66 = arith.constant dense<0xFF800000> : vector<32xf32>
    %251 = vector.multi_reduction <maximumf>, %250, %cst_66 [1] : vector<32x64xf32> to vector<32xf32>
    %252 = vector.shape_cast %251 : vector<32xf32> to vector<32x1xf32>
    %253 = arith.subf %252, %34 : vector<32x1xf32>
    %254 = math.exp %253 : vector<32x1xf32>
    %255 = arith.addf %246, %254 : vector<32x1xf32>
    %256 = vector.broadcast %252 : vector<32x1xf32> to vector<32x64xf32>
    %257 = arith.cmpf olt, %31, %256 : vector<32x64xf32>
    %cst_67 = arith.constant 0xFF800000 : f32
    %258 = vector.broadcast %cst_67 : f32 to vector<32x64xf32>
    %259 = arith.select %257, %31, %258 : vector<32x64xi1>, vector<32x64xf32>
    %cst_68 = arith.constant dense<0xFF800000> : vector<32xf32>
    %260 = vector.multi_reduction <maximumf>, %259, %cst_68 [1] : vector<32x64xf32> to vector<32xf32>
    %261 = vector.shape_cast %260 : vector<32xf32> to vector<32x1xf32>
    %262 = arith.subf %261, %34 : vector<32x1xf32>
    %263 = math.exp %262 : vector<32x1xf32>
    %264 = arith.addf %255, %263 : vector<32x1xf32>
    %265 = vector.broadcast %261 : vector<32x1xf32> to vector<32x64xf32>
    %266 = arith.cmpf olt, %31, %265 : vector<32x64xf32>
    %cst_69 = arith.constant 0xFF800000 : f32
    %267 = vector.broadcast %cst_69 : f32 to vector<32x64xf32>
    %268 = arith.select %266, %31, %267 : vector<32x64xi1>, vector<32x64xf32>
    %cst_70 = arith.constant dense<0xFF800000> : vector<32xf32>
    %269 = vector.multi_reduction <maximumf>, %268, %cst_70 [1] : vector<32x64xf32> to vector<32xf32>
    %270 = vector.shape_cast %269 : vector<32xf32> to vector<32x1xf32>
    %271 = arith.subf %270, %34 : vector<32x1xf32>
    %272 = math.exp %271 : vector<32x1xf32>
    %273 = arith.addf %264, %272 : vector<32x1xf32>
    %274 = vector.broadcast %270 : vector<32x1xf32> to vector<32x64xf32>
    %275 = arith.cmpf olt, %31, %274 : vector<32x64xf32>
    %cst_71 = arith.constant 0xFF800000 : f32
    %276 = vector.broadcast %cst_71 : f32 to vector<32x64xf32>
    %277 = arith.select %275, %31, %276 : vector<32x64xi1>, vector<32x64xf32>
    %cst_72 = arith.constant dense<0xFF800000> : vector<32xf32>
    %278 = vector.multi_reduction <maximumf>, %277, %cst_72 [1] : vector<32x64xf32> to vector<32xf32>
    %279 = vector.shape_cast %278 : vector<32xf32> to vector<32x1xf32>
    %280 = arith.subf %279, %34 : vector<32x1xf32>
    %281 = math.exp %280 : vector<32x1xf32>
    %282 = arith.addf %273, %281 : vector<32x1xf32>
    %283 = vector.broadcast %279 : vector<32x1xf32> to vector<32x64xf32>
    %284 = arith.cmpf olt, %31, %283 : vector<32x64xf32>
    %cst_73 = arith.constant 0xFF800000 : f32
    %285 = vector.broadcast %cst_73 : f32 to vector<32x64xf32>
    %286 = arith.select %284, %31, %285 : vector<32x64xi1>, vector<32x64xf32>
    %cst_74 = arith.constant dense<0xFF800000> : vector<32xf32>
    %287 = vector.multi_reduction <maximumf>, %286, %cst_74 [1] : vector<32x64xf32> to vector<32xf32>
    %288 = vector.shape_cast %287 : vector<32xf32> to vector<32x1xf32>
    %289 = arith.subf %288, %34 : vector<32x1xf32>
    %290 = math.exp %289 : vector<32x1xf32>
    %291 = arith.addf %282, %290 : vector<32x1xf32>
    %292 = vector.broadcast %288 : vector<32x1xf32> to vector<32x64xf32>
    %293 = arith.cmpf olt, %31, %292 : vector<32x64xf32>
    %cst_75 = arith.constant 0xFF800000 : f32
    %294 = vector.broadcast %cst_75 : f32 to vector<32x64xf32>
    %295 = arith.select %293, %31, %294 : vector<32x64xi1>, vector<32x64xf32>
    %cst_76 = arith.constant dense<0xFF800000> : vector<32xf32>
    %296 = vector.multi_reduction <maximumf>, %295, %cst_76 [1] : vector<32x64xf32> to vector<32xf32>
    %297 = vector.shape_cast %296 : vector<32xf32> to vector<32x1xf32>
    %298 = arith.subf %297, %34 : vector<32x1xf32>
    %299 = math.exp %298 : vector<32x1xf32>
    %300 = arith.addf %291, %299 : vector<32x1xf32>
    %301 = math.log %300 : vector<32x1xf32>
    %302 = arith.addf %301, %34 : vector<32x1xf32>
    %303 = arith.subf %302, %16 : vector<32x1xf32>
    %c0_77 = arith.constant 0 : index
    %c0_78 = arith.constant 0 : index
    %304 = vector.load %arg7[%c0_77, %c0_78] : memref<32x1xf32, #tpu.memory_space<vmem>>, vector<32x1xf32>
    tpu.vector_store %arg7[%c0_77, %c0_78], %303 {strides = array<i32>} : memref<32x1xf32, #tpu.memory_space<vmem>>, vector<32x1xf32>,
    return
  }
  func.func @transform_0(%arg0: i32) -> (i32, i32) {
    %c0_i32 = arith.constant 0 : i32
    %c0_i32_0 = arith.constant 0 : i32
    return %arg0, %c0_i32 : i32, i32
  }
  func.func @transform_1(%arg0: i32) -> (i32, i32) {
    %c0_i32 = arith.constant 0 : i32
    %c0_i32_0 = arith.constant 0 : i32
    %c0_i32_1 = arith.constant 0 : i32
    return %c0_i32, %c0_i32_0 : i32, i32
  }
  func.func @transform_2(%arg0: i32) -> (i32, i32) {
    %c0_i32 = arith.constant 0 : i32
    %c0_i32_0 = arith.constant 0 : i32
    %c0_i32_1 = arith.constant 0 : i32
    return %c0_i32, %c0_i32_0 : i32, i32
  }
  func.func @transform_3(%arg0: i32) -> (i32, i32) {
    %c0_i32 = arith.constant 0 : i32
    %c0_i32_0 = arith.constant 0 : i32
    return %arg0, %c0_i32 : i32, i32
  }
  func.func @transform_4(%arg0: i32) -> (i32, i32) {
    %c0_i32 = arith.constant 0 : i32
    %c0_i32_0 = arith.constant 0 : i32
    return %arg0, %c0_i32 : i32, i32
  }
  func.func @transform_5(%arg0: i32) -> (i32, i32) {
    %c0_i32 = arith.constant 0 : i32
    %c0_i32_0 = arith.constant 0 : i32
    %c0_i32_1 = arith.constant 0 : i32
    return %c0_i32, %c0_i32_0 : i32, i32
  }
  func.func @transform_6(%arg0: i32) -> (i32, i32) {
    %c0_i32 = arith.constant 0 : i32
    %c0_i32_0 = arith.constant 0 : i32
    return %arg0, %c0_i32 : i32, i32
  }
}

</mosaic_0001>

<bundles_post_ra>
// kernel: tpu_custom_call.1
= control target key start
LH: loop header
LB: loop body
LE: loop exit
PB: predicated region body
PF: predicated region fallthrough
CT: control target
= control target key end

     0   :  { %s2079_s21 = smov 0   ;;  %s3228_s0 = inlined_call_operand.vmem [shape: f32[64,32], index: 0, kind: input, shape index: {}]   ;;  %s3229_s1 = inlined_call_operand.vmem [shape: f32[64,32], index: 1, kind: input, shape index: {}]   ;;  %s3230_s2 = inlined_call_operand.vmem [shape: f32[1,64], index: 2, kind: input, shape index: {}]   ;;  %s3231_s3 = inlined_call_operand.vmem [shape: f32[64,1], index: 3, kind: input, shape index: {}]   ;;  %s3232_s4 = inlined_call_operand.vmem [shape: s32[64,1], index: 4, kind: input, shape index: {}]   ;;  %s3233_s5 = inlined_call_operand.vmem [shape: s32[1,64], index: 5, kind: input, shape index: {}]   ;;  %s3234_s6 = inlined_call_operand.vmem [shape: f32[64,1], index: 6, kind: output, shape index: {}]  }
   0x1 LB: > { %s1701_s22 = sadd.s32 4294967295, %s2041_s21   ;;  %p1705_p0 = scmp.ge.s32.totalorder %s2041_s21, 1  ;;  %s2041_s21 = sphi %s2079_s21, %s16_s21  }
   0x2   : > { %p235_p1 = scmp.lt.s32.totalorder %s2041_s21, 3 }
   0x4   : > { %p236_p2 = pnand %p1705_p0, %p235_p1 }
   0x6   : > { %239 = sbr.rel (%p236_p2) target bundleno = 3813 (0xee5), region = 44 }
   0xb   : > { %vm307_vm0 = vcmask 261120   ;;  %v405_v0 = vld [vmem:[%s3229_s1 + $0x38] sm:$0xff]  ;;  %s1706_s25 = sshll.u32 %s1701_s22, 2  ;;  %v404_v1 = vld [vmem:[%s3229_s1 + $0x30] sm:$0xff]  ;;  %v2043_v2 = vmov 0   ;;  %v403_v3 = vld [vmem:[%s3229_s1 + $0x28] sm:$0xff] }
   0xc   : > { %1715 = vmatpush.xpose.msk.msra.mxu0 %vm307_vm0, %v405_v0  ;;  %1729 = vmatpush.xpose.msk.msra.mxu1 %vm307_vm0, %v405_v0  ;;  %p276_p3 = scmp.lt.s32.totalorder %s1706_s25, 7  ;;  %v402_v11 = vld [vmem:[%s3229_s1 + $0x20] sm:$0xff]  ;;  %v401_v16 = vld [vmem:[%s3229_s1 + $0x18] sm:$0xff]  ;;  %v400_v19 = vld [vmem:[%s3229_s1 + $0x10] sm:$0xff]  ;;  %vm509_vm13 = vcmask 523264   ;;  %s1714_s30 = sshll.u32 %s1701_s22, 5 }
   0xd   : > { %1730 = vmatpush.xpose.msk.msra.mxu2 %vm307_vm0, %v405_v0  ;;  %1731 = vmatpush.xpose.msk.msra.mxu3 %vm307_vm0, %v405_v0  ;;  %v399_v21 = vld [vmem:[%s3229_s1 + $0x8] sm:$0xff]  ;;  %v398_v22 = vld [vmem:[%s3229_s1] sm:$0xff]  ;;  %s365_s10 = scalar_lea.vmem %s3229_s1, %s1714_s30 }
   0xe   : > { %s3452_s25 = smov (!%p276_p3, %s1706_s25), 7  ;;  %1764 = vset.pattern.permute.xlu1 %v2043_v2  ;;  %1763 = vset.pattern.permute.xlu0 %v2043_v2  ;;  %v1765_v54 = vld [vmem:[%s3233_s5] ss:$0 sm:$0xff] }
   0xf   : > { %1762 = vset.pattern.permute.xlu2 %v2043_v2  ;;  %s2101_s28 = sshll.u32 %s3452_s25, 3  ;;  %v1766_v55 = vld [vmem:[%s3230_s2] ss:$0 sm:$0xff] }
  0x10   : > { %1716 = vmatpush.xpose.msk.msra.mxu0 %vm307_vm0, %v404_v1  ;;  %1732 = vmatpush.xpose.msk.msra.mxu1 %vm307_vm0, %v404_v1  ;;  %s2112_s9 = scalar_lea.vmem %s3228_s0, %s2101_s28  ;;  %s2131_s14 = scalar_lea.vmem %s3232_s4, %s2101_s28 }
  0x11   : > { %1733 = vmatpush.xpose.msk.msra.mxu2 %vm307_vm0, %v404_v1  ;;  %1734 = vmatpush.xpose.msk.msra.mxu3 %vm307_vm0, %v404_v1  ;;  %v299_v4 = vld [vmem:[%s2112_s9] sm:$0xff]  ;;  %v301_v5 = vld [vmem:[%s2112_s9 + $0x10] sm:$0xff]  ;;  %v300_v8 = vld [vmem:[%s2112_s9 + $0x8] sm:$0xff]  ;;  %s2898_s11 = scalar_lea.vmem %s3231_s3, %s2101_s28 }
  0x12   : > { %v303_v6 = vmul.f32 %v299_v4, %v299_v4  ;;  %v305_v7 = vmul.f32 %v301_v5, %v301_v5  ;;  %v302_v9 = vld [vmem:[%s2112_s9 + $0x18] sm:$0xff]  ;;  %v304_v13 = vmul.f32 %v300_v8, %v300_v8  ;;  %v483_v15 = vld [vmem:[%s2131_s14] sm:$0xff]  ;;  %v484_v20 = vld [vmem:[%s2131_s14 + $0x8] sm:$0xff] }
  0x13   : > { %v306_v14 = vmul.f32 %v302_v9, %v302_v9  ;;  %489 = vperm.xlu2 %1762, %v483_v15   ;;  %v485_v23 = vld [vmem:[%s2131_s14 + $0x10] sm:$0xff]  ;;  %v486_v24 = vld [vmem:[%s2131_s14 + $0x18] sm:$0xff]  ;;  %s3180_s14 = scalar_lea.vmem %s3234_s6, %s2101_s28 }
  0x14   : > { %1717 = vmatpush.xpose.msk.msra.mxu0 %vm307_vm0, %v403_v3  ;;  %1735 = vmatpush.xpose.msk.msra.mxu1 %vm307_vm0, %v403_v3  ;;  %v308_v10 = vsel %vm307_vm0, %v303_v6, 0.0  ;;  %v314_v12 = vsel %vm307_vm0, %v305_v7, 0.0  ;;  %v311_v17 = vsel %vm307_vm0, %v304_v13, 0.0 }
  0x15   : > { %1736 = vmatpush.xpose.msk.msra.mxu2 %vm307_vm0, %v403_v3  ;;  %1737 = vmatpush.xpose.msk.msra.mxu3 %vm307_vm0, %v403_v3  ;;  %v317_v18 = vsel %vm307_vm0, %v306_v14, 0.0 }
  0x16   : > { %309 = vadd.xlane.f32.xlu0 %v308_v10  ;;  %315 = vadd.xlane.f32.xlu1 %v314_v12 }
  0x18   : > { %1718 = vmatpush.xpose.msk.msra.mxu0 %vm307_vm0, %v402_v11  ;;  %1738 = vmatpush.xpose.msk.msra.mxu1 %vm307_vm0, %v402_v11 }
  0x19   : > { %1739 = vmatpush.xpose.msk.msra.mxu2 %vm307_vm0, %v402_v11  ;;  %1740 = vmatpush.xpose.msk.msra.mxu3 %vm307_vm0, %v402_v11 }
  0x1b   : > { %492 = vperm.xlu2 %1762, %v484_v20  }
  0x1c   : > { %1719 = vmatpush.xpose.msk.msra.mxu0 %vm307_vm0, %v401_v16  ;;  %1741 = vmatpush.xpose.msk.msra.mxu1 %vm307_vm0, %v401_v16 }
  0x1d   : > { %1742 = vmatpush.xpose.msk.msra.mxu2 %vm307_vm0, %v401_v16  ;;  %1743 = vmatpush.xpose.msk.msra.mxu3 %vm307_vm0, %v401_v16 }
  0x1e   : > { %312 = vadd.xlane.f32.xlu0 %v311_v17  ;;  %318 = vadd.xlane.f32.xlu1 %v317_v18 }
  0x20   : > { %1720 = vmatpush.xpose.msk.msra.mxu0 %vm307_vm0, %v400_v19  ;;  %1744 = vmatpush.xpose.msk.msra.mxu1 %vm307_vm0, %v400_v19 }
  0x21   : > { %1745 = vmatpush.xpose.msk.msra.mxu2 %vm307_vm0, %v400_v19  ;;  %1746 = vmatpush.xpose.msk.msra.mxu3 %vm307_vm0, %v400_v19 }
  0x24   : > { %1721 = vmatpush.xpose.msk.msra.mxu0 %vm307_vm0, %v399_v21  ;;  %1747 = vmatpush.xpose.msk.msra.mxu1 %vm307_vm0, %v399_v21 }
  0x25   : > { %1748 = vmatpush.xpose.msk.msra.mxu2 %vm307_vm0, %v399_v21  ;;  %1749 = vmatpush.xpose.msk.msra.mxu3 %vm307_vm0, %v399_v21 }
  0x28   : > { %1722 = vmatpush.xpose.msk.msra.mxu0 %vm307_vm0, %v398_v22  ;;  %1750 = vmatpush.xpose.msk.msra.mxu1 %vm307_vm0, %v398_v22 }
  0x29   : > { %1751 = vmatpush.xpose.msk.msra.mxu2 %vm307_vm0, %v398_v22  ;;  %1752 = vmatpush.xpose.msk.msra.mxu3 %vm307_vm0, %v398_v22 }
  0x2b   : > { %1723 = vmatmul.msk.f32.vlgmr.msra.gmra.mxu0 %vm307_vm0, %v299_v4  ;;  %1724 = vmatmul.msk.f32.vlgmr.msra.gmra.mxu1 %vm307_vm0, %v300_v8 }
  0x2c   : > { %1725 = vmatmul.msk.f32.vlgmr.msra.gmra.mxu2 %vm307_vm0, %v301_v5  ;;  %1726 = vmatmul.msk.f32.vlgmr.msra.gmra.mxu3 %vm307_vm0, %v302_v9 }
  0x32   : > { %495 = vperm.xlu0 %1763, %v485_v23  }
  0x37   : > { %498 = vperm.xlu1 %1764, %v486_v24  }
  0x6d   : > { %v490_v44 = vpop.permute.xlu2 %489 }
  0x6e   : > { %vm501_vm11 = vcmp.eq.s32.totalorder %v490_v44, %v1765_v54 }
  0x75   : > { %v493_v56 = vpop.permute.xlu2 %492 }
  0x76   : > { %vm502_vm12 = vcmp.eq.s32.totalorder %v493_v56, %v1765_v54 }
  0x89   : > { %v310_v25 = vpop.xlane.xlu0 %309  ;;  %v316_v26 = vpop.xlane.xlu1 %315 }
  0x8a   : > { %v320_v27 = vmax.f32 %v310_v25, 1e-24  ;;  %v322_v28 = vmax.f32 %v316_v26, 1e-24 }
  0x8c   : > { %1767 = vrsqrt.f32 %v320_v27  ;;  %vm330_vm1 = vweird.f32 %v320_v27  ;;  %vm350_vm7 = vweird.f32 %v322_v28 }
  0x8d   : > { %1769 = vrsqrt.f32 %v322_v28 }
  0x91   : > { %v313_v29 = vpop.xlane.xlu0 %312  ;;  %v319_v30 = vpop.xlane.xlu1 %318 }
  0x92   : > { %v1768_v31 = vpop.eup %1767  ;;  %v321_v32 = vmax.f32 %v313_v29, 1e-24  ;;  %v323_v33 = vmax.f32 %v319_v30, 1e-24 }
  0x93   : > { %v325_v34 = vmul.f32 %v1768_v31, %v320_v27  ;;  %v1770_v35 = vpop.eup %1769  ;;  %vm331_vm2 = vweird.f32 %v1768_v31 }
  0x94   : > { %1771 = vrsqrt.f32 %v321_v32  ;;  %v345_v39 = vmul.f32 %v1770_v35, %v322_v28  ;;  %vm340_vm3 = vweird.f32 %v321_v32  ;;  %vm332_vm5 = vmor %vm330_vm1, %vm331_vm2  ;;  %vm351_vm8 = vweird.f32 %v1770_v35 }
  0x95   : > { %1773 = vrsqrt.f32 %v323_v33  ;;  %v326_v36 = vmul.f32 %v1768_v31, %v325_v34  ;;  %vm360_vm9 = vweird.f32 %v323_v33  ;;  %vm352_vm14 = vmor %vm350_vm7, %vm351_vm8 }
  0x96   : > { %v346_v45 = vmul.f32 %v1770_v35, %v345_v39 }
  0x97   : > { %v327_v41 = vmul.f32 0.5, %v326_v36 }
  0x98   : > { %v347_v50 = vmul.f32 0.5, %v346_v45 }
  0x99   : > { %v328_v48 = vsub.f32 1.5, %v327_v41 }
  0x9a   : > { %v1772_v37 = vpop.eup %1771  ;;  %v348_v57 = vsub.f32 1.5, %v347_v50 }
  0x9b   : > { %v1774_v38 = vpop.eup %1773  ;;  %v335_v40 = vmul.f32 %v1772_v37, %v321_v32  ;;  %v329_v52 = vmul.f32 %v1768_v31, %v328_v48  ;;  %vm341_vm4 = vweird.f32 %v1772_v37 }
  0x9c   : > { %v355_v42 = vmul.f32 %v1774_v38, %v323_v33  ;;  %vm342_vm6 = vmor %vm340_vm3, %vm341_vm4  ;;  %vm361_vm10 = vweird.f32 %v1774_v38  ;;  %v349_v3 = vmul.f32 %v1770_v35, %v348_v57 }
  0x9d   : > { %v336_v43 = vmul.f32 %v1772_v37, %v335_v40  ;;  %v2181_v59 = vsel %vm332_vm5, %v1768_v31, %v329_v52  ;;  %vm362_vm15 = vmor %vm360_vm9, %vm361_vm10 }
  0x9e   : > { %v356_v47 = vmul.f32 %v1774_v38, %v355_v42  ;;  %v2195_v11 = vsel %vm352_vm14, %v1770_v35, %v349_v3 }
  0x9f   : > { %v337_v46 = vmul.f32 0.5, %v336_v43 }
  0xa0   : > { %v357_v51 = vmul.f32 0.5, %v356_v47 }
  0xa1   : > { %v338_v49 = vsub.f32 1.5, %v337_v46 }
  0xa2   : > { %v358_v58 = vsub.f32 1.5, %v357_v51 }
  0xa3   : > { %v339_v53 = vmul.f32 %v1772_v37, %v338_v49 }
  0xa4   : > { %v359_v4 = vmul.f32 %v1774_v38, %v358_v58  ;;  %v496_v10 = vpop.permute.xlu0 %495 }
  0xa5   : > { %v2183_v61 = vsel %vm342_vm6, %v1772_v37, %v339_v53  ;;  %vm503_vm2 = vcmp.eq.s32.totalorder %v496_v10, %v1765_v54 }
  0xa6   : > { %v2197_v13 = vsel %vm362_vm15, %v1774_v38, %v359_v4 }
  0xa8   : > { %v459_v60 = vpop.f32.mrf.mxu0  ;;  %v462_v62 = vpop.f32.mrf.mxu1 }
  0xa9   : > { %v471_v63 = vmul.f32 %v459_v60, %v2181_v59  ;;  %v472_v0 = vmul.f32 %v462_v62, %v2183_v61  ;;  %v499_v9 = vpop.permute.xlu1 %498 }
  0xaa   : > { %vm504_vm1 = vcmp.eq.s32.totalorder %v499_v9, %v1765_v54 }
  0xab   : > { %v479_v1 = vmul.f32 %v1766_v55, %v471_v63  ;;  %v480_v2 = vmul.f32 %v1766_v55, %v472_v0 }
  0xad   : > { %v2187_v5 = vsel %vm501_vm11, -1e+09, %v479_v1  ;;  %v2189_v6 = vsel %vm502_vm12, -1e+09, %v480_v2 }
  0xae   : > { %v510_v7 = vsel %vm509_vm13, %v2187_v5, -inf  ;;  %v513_v8 = vsel %vm509_vm13, %v2189_v6, -inf }
  0xaf   : > { %v465_v12 = vpop.f32.mrf.mxu2  ;;  %v468_v14 = vpop.f32.mrf.mxu3  ;;  %511 = vmax.xlane.f32.xlu2 %v510_v7  ;;  %514 = vmax.xlane.f32.xlu1 %v513_v8 }
  0xb0   : > { %v473_v15 = vmul.f32 %v465_v12, %v2195_v11  ;;  %v474_v16 = vmul.f32 %v468_v14, %v2197_v13 }
  0xb2   : > { %v481_v17 = vmul.f32 %v1766_v55, %v473_v15  ;;  %v482_v18 = vmul.f32 %v1766_v55, %v474_v16 }
  0xb4   : > { %v2201_v19 = vsel %vm504_vm1, -1e+09, %v482_v18  ;;  %v2203_v20 = vsel %vm503_vm2, -1e+09, %v481_v17 }
  0xb5   : > { %v516_v21 = vsel %vm509_vm13, %v2203_v20, -inf  ;;  %v519_v22 = vsel %vm509_vm13, %v2201_v19, -inf }
  0xb6   : > { %517 = vmax.xlane.f32.xlu0 %v516_v21 }
  0xb7   : > { %520 = vmax.xlane.f32.xlu2 %v519_v22 }
 0x122   : > { %v2209_v23 = vpop.xlane.xlu2 %511  ;;  %v2213_v24 = vpop.xlane.xlu1 %514 }
 0x123   : > { %vm554_vm3 = vcmp.lt.f32.partialorder %v2187_v5, %v2209_v23  ;;  %vm555_vm4 = vcmp.lt.f32.partialorder %v2189_v6, %v2213_v24 }
 0x124   : > { %v558_v25 = vsel %vm554_vm3, %v2187_v5, -inf  ;;  %v559_v28 = vsel %vm555_vm4, %v2189_v6, -inf }
 0x125   : > { %v562_v26 = vsel %vm509_vm13, %v558_v25, -inf  ;;  %v565_v32 = vsel %vm509_vm13, %v559_v28, -inf }
 0x126   : > { %563 = vmax.xlane.f32.xlu2 %v562_v26 }
 0x129   : > { %v2224_v29 = vpop.xlane.xlu0 %517 }
 0x12a   : > { %v2219_v27 = vpop.xlane.xlu2 %520  ;;  %vm556_vm6 = vcmp.lt.f32.partialorder %v2203_v20, %v2224_v29 }
 0x12b   : > { %vm557_vm5 = vcmp.lt.f32.partialorder %v2201_v19, %v2219_v27  ;;  %v560_v33 = vsel %vm556_vm6, %v2203_v20, -inf }
 0x12c   : > { %v561_v30 = vsel %vm557_vm5, %v2201_v19, -inf  ;;  %v568_v34 = vsel %vm509_vm13, %v560_v33, -inf }
 0x12d   : > { %v571_v31 = vsel %vm509_vm13, %v561_v30, -inf }
 0x12e   : > { %572 = vmax.xlane.f32.xlu1 %v571_v31  ;;  %566 = vmax.xlane.f32.xlu2 %v565_v32 }
 0x136   : > { %569 = vmax.xlane.f32.xlu2 %v568_v34 }
 0x199   : > { %v2233_v35 = vpop.xlane.xlu2 %563 }
 0x19a   : > { %vm590_vm7 = vcmp.lt.f32.partialorder %v2187_v5, %v2233_v35 }
 0x19b   : > { %v594_v36 = vsel %vm590_vm7, %v2187_v5, -inf }
 0x19c   : > { %v598_v37 = vsel %vm509_vm13, %v594_v36, -inf }
 0x19d   : > { %599 = vmax.xlane.f32.xlu2 %v598_v37 }
 0x1a1   : > { %v2239_v38 = vpop.xlane.xlu2 %566  ;;  %v2241_v39 = vpop.xlane.xlu1 %572 }
 0x1a2   : > { %vm591_vm8 = vcmp.lt.f32.partialorder %v2189_v6, %v2239_v38  ;;  %vm593_vm9 = vcmp.lt.f32.partialorder %v2201_v19, %v2241_v39 }
 0x1a3   : > { %v595_v40 = vsel %vm591_vm8, %v2189_v6, -inf  ;;  %v597_v41 = vsel %vm593_vm9, %v2201_v19, -inf }
 0x1a4   : > { %v601_v42 = vsel %vm509_vm13, %v595_v40, -inf  ;;  %v607_v43 = vsel %vm509_vm13, %v597_v41, -inf }
 0x1a5   : > { %602 = vmax.xlane.f32.xlu1 %v601_v42  ;;  %608 = vmax.xlane.f32.xlu0 %v607_v43 }
 0x1a9   : > { %v2251_v44 = vpop.xlane.xlu2 %569 }
 0x1aa   : > { %vm592_vm10 = vcmp.lt.f32.partialorder %v2203_v20, %v2251_v44 }
 0x1ab   : > { %v596_v45 = vsel %vm592_vm10, %v2203_v20, -inf }
 0x1ac   : > { %v604_v46 = vsel %vm509_vm13, %v596_v45, -inf }
 0x1ad   : > { %605 = vmax.xlane.f32.xlu2 %v604_v46 }
 0x210   : > { %v2257_v47 = vpop.xlane.xlu2 %599 }
 0x211   : > { %vm626_vm11 = vcmp.lt.f32.partialorder %v2187_v5, %v2257_v47 }
 0x212   : > { %v630_v48 = vsel %vm626_vm11, %v2187_v5, -inf }
 0x213   : > { %v634_v49 = vsel %vm509_vm13, %v630_v48, -inf }
 0x214   : > { %635 = vmax.xlane.f32.xlu1 %v634_v49 }
 0x218   : > { %v2263_v50 = vpop.xlane.xlu1 %602  ;;  %v2265_v51 = vpop.xlane.xlu0 %608 }
 0x219   : > { %vm627_vm12 = vcmp.lt.f32.partialorder %v2189_v6, %v2263_v50  ;;  %vm629_vm14 = vcmp.lt.f32.partialorder %v2201_v19, %v2265_v51 }
 0x21a   : > { %v631_v52 = vsel %vm627_vm12, %v2189_v6, -inf  ;;  %v633_v53 = vsel %vm629_vm14, %v2201_v19, -inf }
 0x21b   : > { %v637_v54 = vsel %vm509_vm13, %v631_v52, -inf  ;;  %v643_v55 = vsel %vm509_vm13, %v633_v53, -inf }
 0x21c   : > { %638 = vmax.xlane.f32.xlu2 %v637_v54  ;;  %644 = vmax.xlane.f32.xlu1 %v643_v55 }
 0x220   : > { %v2275_v56 = vpop.xlane.xlu2 %605 }
 0x221   : > { %vm628_vm15 = vcmp.lt.f32.partialorder %v2203_v20, %v2275_v56 }
 0x222   : > { %v632_v57 = vsel %vm628_vm15, %v2203_v20, -inf }
 0x223   : > { %v640_v58 = vsel %vm509_vm13, %v632_v57, -inf }
 0x224   : > { %641 = vmax.xlane.f32.xlu0 %v640_v58 }
 0x287   : > { %v2281_v60 = vpop.xlane.xlu1 %635 }
 0x288   : > { %vm662_vm1 = vcmp.lt.f32.partialorder %v2187_v5, %v2281_v60 }
 0x289   : > { %v666_v62 = vsel %vm662_vm1, %v2187_v5, -inf }
 0x28a   : > { %v670_v63 = vsel %vm509_vm13, %v666_v62, -inf }
 0x28b   : > { %671 = vmax.xlane.f32.xlu2 %v670_v63 }
 0x28f   : > { %v2287_v0 = vpop.xlane.xlu2 %638  ;;  %v2289_v1 = vpop.xlane.xlu1 %644 }
 0x290   : > { %vm663_vm2 = vcmp.lt.f32.partialorder %v2189_v6, %v2287_v0  ;;  %vm665_vm3 = vcmp.lt.f32.partialorder %v2201_v19, %v2289_v1 }
 0x291   : > { %v667_v2 = vsel %vm663_vm2, %v2189_v6, -inf  ;;  %v669_v3 = vsel %vm665_vm3, %v2201_v19, -inf }
 0x292   : > { %v673_v4 = vsel %vm509_vm13, %v667_v2, -inf  ;;  %v679_v7 = vsel %vm509_vm13, %v669_v3, -inf }
 0x293   : > { %674 = vmax.xlane.f32.xlu0 %v673_v4  ;;  %680 = vmax.xlane.f32.xlu2 %v679_v7 }
 0x297   : > { %v2299_v8 = vpop.xlane.xlu0 %641 }
 0x298   : > { %vm664_vm4 = vcmp.lt.f32.partialorder %v2203_v20, %v2299_v8 }
 0x299   : > { %v668_v9 = vsel %vm664_vm4, %v2203_v20, -inf }
 0x29a   : > { %v676_v10 = vsel %vm509_vm13, %v668_v9, -inf }
 0x29b   : > { %677 = vmax.xlane.f32.xlu1 %v676_v10 }
 0x2fe   : > { %v2305_v12 = vpop.xlane.xlu2 %671 }
 0x2ff   : > { %vm698_vm5 = vcmp.lt.f32.partialorder %v2187_v5, %v2305_v12 }
 0x300   : > { %v702_v14 = vsel %vm698_vm5, %v2187_v5, -inf }
 0x301   : > { %v706_v15 = vsel %vm509_vm13, %v702_v14, -inf }
 0x302   : > { %707 = vmax.xlane.f32.xlu0 %v706_v15 }
 0x306   : > { %v2311_v16 = vpop.xlane.xlu2 %680  ;;  %v2313_v17 = vpop.xlane.xlu0 %674 }
 0x307   : > { %vm701_vm6 = vcmp.lt.f32.partialorder %v2201_v19, %v2311_v16  ;;  %vm699_vm7 = vcmp.lt.f32.partialorder %v2189_v6, %v2313_v17 }
 0x308   : > { %v705_v18 = vsel %vm701_vm6, %v2201_v19, -inf  ;;  %v703_v21 = vsel %vm699_vm7, %v2189_v6, -inf }
 0x309   : > { %v715_v22 = vsel %vm509_vm13, %v705_v18, -inf  ;;  %v709_v25 = vsel %vm509_vm13, %v703_v21, -inf }
 0x30a   : > { %716 = vmax.xlane.f32.xlu0 %v715_v22  ;;  %710 = vmax.xlane.f32.xlu1 %v709_v25 }
 0x30e   : > { %v2323_v26 = vpop.xlane.xlu1 %677 }
 0x30f   : > { %vm700_vm8 = vcmp.lt.f32.partialorder %v2203_v20, %v2323_v26 }
 0x310   : > { %v704_v28 = vsel %vm700_vm8, %v2203_v20, -inf }
 0x311   : > { %v712_v30 = vsel %vm509_vm13, %v704_v28, -inf }
 0x312   : > { %713 = vmax.xlane.f32.xlu2 %v712_v30 }
 0x375   : > { %v2329_v31 = vpop.xlane.xlu0 %707 }
 0x376   : > { %vm734_vm9 = vcmp.lt.f32.partialorder %v2187_v5, %v2329_v31 }
 0x377   : > { %v738_v32 = vsel %vm734_vm9, %v2187_v5, -inf }
 0x378   : > { %v742_v33 = vsel %vm509_vm13, %v738_v32, -inf }
 0x379   : > { %743 = vmax.xlane.f32.xlu1 %v742_v33 }
 0x37d   : > { %v2335_v34 = vpop.xlane.xlu1 %710  ;;  %v2337_v36 = vpop.xlane.xlu0 %716 }
 0x37e   : > { %vm735_vm10 = vcmp.lt.f32.partialorder %v2189_v6, %v2335_v34  ;;  %vm737_vm11 = vcmp.lt.f32.partialorder %v2201_v19, %v2337_v36 }
 0x37f   : > { %v739_v37 = vsel %vm735_vm10, %v2189_v6, -inf  ;;  %v741_v40 = vsel %vm737_vm11, %v2201_v19, -inf }
 0x380   : > { %v745_v41 = vsel %vm509_vm13, %v739_v37, -inf  ;;  %v751_v42 = vsel %vm509_vm13, %v741_v40, -inf }
 0x381   : > { %746 = vmax.xlane.f32.xlu2 %v745_v41  ;;  %752 = vmax.xlane.f32.xlu1 %v751_v42 }
 0x385   : > { %v2347_v43 = vpop.xlane.xlu2 %713 }
 0x386   : > { %vm736_vm12 = vcmp.lt.f32.partialorder %v2203_v20, %v2347_v43 }
 0x387   : > { %v740_v45 = vsel %vm736_vm12, %v2203_v20, -inf }
 0x388   : > { %v748_v46 = vsel %vm509_vm13, %v740_v45, -inf }
 0x389   : > { %749 = vmax.xlane.f32.xlu0 %v748_v46 }
 0x3ec   : > { %v2353_v48 = vpop.xlane.xlu1 %743 }
 0x3ed   : > { %vm770_vm14 = vcmp.lt.f32.partialorder %v2187_v5, %v2353_v48 }
 0x3ee   : > { %v774_v49 = vsel %vm770_vm14, %v2187_v5, -inf }
 0x3ef   : > { %v778_v52 = vsel %vm509_vm13, %v774_v49, -inf }
 0x3f0   : > { %779 = vmax.xlane.f32.xlu2 %v778_v52 }
 0x3f4   : > { %v2359_v53 = vpop.xlane.xlu2 %746  ;;  %v2361_v54 = vpop.xlane.xlu1 %752 }
 0x3f5   : > { %3307 = vst [vmem:[#allocation2_spill] sm:$0xff] %v2361_v54  ;;  %vm771_vm15 = vcmp.lt.f32.partialorder %v2189_v6, %v2359_v53  ;;  %vm773_vm1 = vcmp.lt.f32.partialorder %v2201_v19, %v2361_v54 }
 0x3f6   : > { %v775_v55 = vsel %vm771_vm15, %v2189_v6, -inf  ;;  %v777_v57 = vsel %vm773_vm1, %v2201_v19, -inf }
 0x3f7   : > { %v781_v58 = vsel %vm509_vm13, %v775_v55, -inf  ;;  %v787_v62 = vsel %vm509_vm13, %v777_v57, -inf }
 0x3f8   : > { %782 = vmax.xlane.f32.xlu0 %v781_v58  ;;  %788 = vmax.xlane.f32.xlu2 %v787_v62 }
 0x3fc   : > { %v2371_v63 = vpop.xlane.xlu0 %749 }
 0x3fd   : > { %3308 = vst [vmem:[#allocation3_spill] sm:$0xff] %v2371_v63  ;;  %vm772_vm2 = vcmp.lt.f32.partialorder %v2203_v20, %v2371_v63  ;;  %v367_v63 = vld [vmem:[%s365_s10 + $0x8] sm:$0xff] }
 0x3fe   : > { %v776_v2 = vsel %vm772_vm2, %v2203_v20, -inf }
 0x3ff   : > { %v784_v3 = vsel %vm509_vm13, %v776_v2, -inf }
 0x400   : > { %785 = vmax.xlane.f32.xlu1 %v784_v3 }
 0x463   : > { %v2377_v4 = vpop.xlane.xlu2 %779 }
 0x464   : > { %vm806_vm3 = vcmp.lt.f32.partialorder %v2187_v5, %v2377_v4 }
 0x465   : > { %v810_v7 = vsel %vm806_vm3, %v2187_v5, -inf }
 0x466   : > { %v814_v9 = vsel %vm509_vm13, %v810_v7, -inf }
 0x467   : > { %815 = vmax.xlane.f32.xlu0 %v814_v9 }
 0x46b   : > { %v2383_v10 = vpop.xlane.xlu2 %788  ;;  %v2385_v14 = vpop.xlane.xlu0 %782 }
 0x46c   : > { %3309 = vst [vmem:[#allocation4_spill] sm:$0xff] %v2383_v10  ;;  %vm809_vm4 = vcmp.lt.f32.partialorder %v2201_v19, %v2383_v10  ;;  %vm807_vm5 = vcmp.lt.f32.partialorder %v2189_v6, %v2385_v14 }
 0x46d   : > { %v813_v15 = vsel %vm809_vm4, %v2201_v19, -inf  ;;  %v811_v18 = vsel %vm807_vm5, %v2189_v6, -inf }
 0x46e   : > { %v823_v21 = vsel %vm509_vm13, %v813_v15, -inf  ;;  %v817_v22 = vsel %vm509_vm13, %v811_v18, -inf }
 0x46f   : > { %824 = vmax.xlane.f32.xlu0 %v823_v21  ;;  %818 = vmax.xlane.f32.xlu1 %v817_v22 }
 0x473   : > { %v2395_v25 = vpop.xlane.xlu1 %785 }
 0x474   : > { %3310 = vst [vmem:[#allocation5_spill] sm:$0xff] %v2395_v25  ;;  %vm808_vm6 = vcmp.lt.f32.partialorder %v2203_v20, %v2395_v25 }
 0x475   : > { %v812_v28 = vsel %vm808_vm6, %v2203_v20, -inf }
 0x476   : > { %v820_v30 = vsel %vm509_vm13, %v812_v28, -inf }
 0x477   : > { %821 = vmax.xlane.f32.xlu2 %v820_v30 }
 0x4da   : > { %v2401_v32 = vpop.xlane.xlu0 %815 }
 0x4db   : > { %vm842_vm7 = vcmp.lt.f32.partialorder %v2187_v5, %v2401_v32 }
 0x4dc   : > { %v846_v33 = vsel %vm842_vm7, %v2187_v5, -inf }
 0x4dd   : > { %v850_v37 = vsel %vm509_vm13, %v846_v33, -inf }
 0x4de   : > { %851 = vmax.xlane.f32.xlu1 %v850_v37 }
 0x4e2   : > { %v2407_v40 = vpop.xlane.xlu1 %818  ;;  %v2409_v41 = vpop.xlane.xlu0 %824 }
 0x4e3   : > { %3311 = vst [vmem:[#allocation6_spill] sm:$0xff] %v2409_v41  ;;  %vm843_vm8 = vcmp.lt.f32.partialorder %v2189_v6, %v2407_v40  ;;  %vm845_vm9 = vcmp.lt.f32.partialorder %v2201_v19, %v2409_v41 }
 0x4e4   : > { %v847_v42 = vsel %vm843_vm8, %v2189_v6, -inf  ;;  %v849_v45 = vsel %vm845_vm9, %v2201_v19, -inf }
 0x4e5   : > { %v853_v46 = vsel %vm509_vm13, %v847_v42, -inf  ;;  %v859_v49 = vsel %vm509_vm13, %v849_v45, -inf }
 0x4e6   : > { %854 = vmax.xlane.f32.xlu2 %v853_v46  ;;  %860 = vmax.xlane.f32.xlu1 %v859_v49 }
 0x4ea   : > { %v2419_v52 = vpop.xlane.xlu2 %821 }
 0x4eb   : > { %3312 = vst [vmem:[#allocation7_spill] sm:$0xff] %v2419_v52  ;;  %vm844_vm10 = vcmp.lt.f32.partialorder %v2203_v20, %v2419_v52 }
 0x4ec   : > { %v848_v55 = vsel %vm844_vm10, %v2203_v20, -inf }
 0x4ed   : > { %v856_v57 = vsel %vm509_vm13, %v848_v55, -inf }
 0x4ee   : > { %857 = vmax.xlane.f32.xlu0 %v856_v57 }
 0x551   : > { %v2425_v58 = vpop.xlane.xlu1 %851 }
 0x552   : > { %vm878_vm11 = vcmp.lt.f32.partialorder %v2187_v5, %v2425_v58 }
 0x553   : > { %v882_v62 = vsel %vm878_vm11, %v2187_v5, -inf }
 0x554   : > { %v886_v2 = vsel %vm509_vm13, %v882_v62, -inf }
 0x555   : > { %887 = vmax.xlane.f32.xlu2 %v886_v2 }
 0x559   : > { %v2431_v3 = vpop.xlane.xlu2 %854  ;;  %v2433_v7 = vpop.xlane.xlu1 %860 }
 0x55a   : > { %3313 = vst [vmem:[#allocation8_spill] sm:$0xff] %v2433_v7  ;;  %vm879_vm12 = vcmp.lt.f32.partialorder %v2189_v6, %v2431_v3  ;;  %vm881_vm14 = vcmp.lt.f32.partialorder %v2201_v19, %v2433_v7 }
 0x55b   : > { %v883_v9 = vsel %vm879_vm12, %v2189_v6, -inf  ;;  %v885_v15 = vsel %vm881_vm14, %v2201_v19, -inf }
 0x55c   : > { %v889_v18 = vsel %vm509_vm13, %v883_v9, -inf  ;;  %v895_v21 = vsel %vm509_vm13, %v885_v15, -inf }
 0x55d   : > { %890 = vmax.xlane.f32.xlu0 %v889_v18  ;;  %896 = vmax.xlane.f32.xlu2 %v895_v21 }
 0x561   : > { %v2443_v22 = vpop.xlane.xlu0 %857 }
 0x562   : > { %3314 = vst [vmem:[#allocation9_spill] sm:$0xff] %v2443_v22  ;;  %vm880_vm15 = vcmp.lt.f32.partialorder %v2203_v20, %v2443_v22 }
 0x563   : > { %v884_v28 = vsel %vm880_vm15, %v2203_v20, -inf }
 0x564   : > { %v892_v30 = vsel %vm509_vm13, %v884_v28, -inf }
 0x565   : > { %893 = vmax.xlane.f32.xlu1 %v892_v30 }
 0x5c8   : > { %v2449_v33 = vpop.xlane.xlu2 %887 }
 0x5c9   : > { %vm914_vm1 = vcmp.lt.f32.partialorder %v2187_v5, %v2449_v33 }
 0x5ca   : > { %v918_v37 = vsel %vm914_vm1, %v2187_v5, -inf }
 0x5cb   : > { %v922_v42 = vsel %vm509_vm13, %v918_v37, -inf }
 0x5cc   : > { %923 = vmax.xlane.f32.xlu0 %v922_v42 }
 0x5d0   : > { %v2455_v45 = vpop.xlane.xlu2 %896  ;;  %v2457_v46 = vpop.xlane.xlu0 %890 }
 0x5d1   : > { %3315 = vst [vmem:[#allocation10_spill] sm:$0xff] %v2455_v45  ;;  %vm917_vm2 = vcmp.lt.f32.partialorder %v2201_v19, %v2455_v45  ;;  %vm915_vm3 = vcmp.lt.f32.partialorder %v2189_v6, %v2457_v46 }
 0x5d2   : > { %v921_v49 = vsel %vm917_vm2, %v2201_v19, -inf  ;;  %v919_v55 = vsel %vm915_vm3, %v2189_v6, -inf }
 0x5d3   : > { %v931_v57 = vsel %vm509_vm13, %v921_v49, -inf  ;;  %v925_v62 = vsel %vm509_vm13, %v919_v55, -inf }
 0x5d4   : > { %932 = vmax.xlane.f32.xlu0 %v931_v57  ;;  %926 = vmax.xlane.f32.xlu1 %v925_v62 }
 0x5d8   : > { %v2467_v2 = vpop.xlane.xlu1 %893 }
 0x5d9   : > { %3316 = vst [vmem:[#allocation11_spill] sm:$0xff] %v2467_v2  ;;  %vm916_vm4 = vcmp.lt.f32.partialorder %v2203_v20, %v2467_v2 }
 0x5da   : > { %v920_v9 = vsel %vm916_vm4, %v2203_v20, -inf }
 0x5db   : > { %v928_v15 = vsel %vm509_vm13, %v920_v9, -inf }
 0x5dc   : > { %929 = vmax.xlane.f32.xlu2 %v928_v15 }
 0x63f   : > { %v2473_v18 = vpop.xlane.xlu0 %923 }
 0x640   : > { %vm950_vm5 = vcmp.lt.f32.partialorder %v2187_v5, %v2473_v18 }
 0x641   : > { %v954_v21 = vsel %vm950_vm5, %v2187_v5, -inf }
 0x642   : > { %v958_v28 = vsel %vm509_vm13, %v954_v21, -inf }
 0x643   : > { %959 = vmax.xlane.f32.xlu1 %v958_v28 }
 0x647   : > { %v2479_v30 = vpop.xlane.xlu1 %926  ;;  %v2481_v37 = vpop.xlane.xlu0 %932 }
 0x648   : > { %3317 = vst [vmem:[#allocation12_spill] sm:$0xff] %v2481_v37  ;;  %vm951_vm6 = vcmp.lt.f32.partialorder %v2189_v6, %v2479_v30  ;;  %vm953_vm7 = vcmp.lt.f32.partialorder %v2201_v19, %v2481_v37 }
 0x649   : > { %v955_v42 = vsel %vm951_vm6, %v2189_v6, -inf  ;;  %v957_v49 = vsel %vm953_vm7, %v2201_v19, -inf }
 0x64a   : > { %v961_v55 = vsel %vm509_vm13, %v955_v42, -inf  ;;  %v967_v57 = vsel %vm509_vm13, %v957_v49, -inf }
 0x64b   : > { %962 = vmax.xlane.f32.xlu2 %v961_v55  ;;  %968 = vmax.xlane.f32.xlu1 %v967_v57 }
 0x64f   : > { %v2491_v62 = vpop.xlane.xlu2 %929 }
 0x650   : > { %3318 = vst [vmem:[#allocation13_spill] sm:$0xff] %v2491_v62  ;;  %vm952_vm8 = vcmp.lt.f32.partialorder %v2203_v20, %v2491_v62 }
 0x651   : > { %v956_v9 = vsel %vm952_vm8, %v2203_v20, -inf }
 0x652   : > { %v964_v15 = vsel %vm509_vm13, %v956_v9, -inf }
 0x653   : > { %965 = vmax.xlane.f32.xlu0 %v964_v15 }
 0x6b6   : > { %v2497_v21 = vpop.xlane.xlu1 %959 }
 0x6b7   : > { %vm986_vm9 = vcmp.lt.f32.partialorder %v2187_v5, %v2497_v21 }
 0x6b8   : > { %v990_v28 = vsel %vm986_vm9, %v2187_v5, -inf }
 0x6b9   : > { %v994_v42 = vsel %vm509_vm13, %v990_v28, -inf }
 0x6ba   : > { %995 = vmax.xlane.f32.xlu2 %v994_v42 }
 0x6be   : > { %v2503_v49 = vpop.xlane.xlu2 %962  ;;  %v2505_v55 = vpop.xlane.xlu1 %968 }
 0x6bf   : > { %3319 = vst [vmem:[#allocation14_spill] sm:$0xff] %v2505_v55  ;;  %vm987_vm10 = vcmp.lt.f32.partialorder %v2189_v6, %v2503_v49  ;;  %vm989_vm11 = vcmp.lt.f32.partialorder %v2201_v19, %v2505_v55 }
 0x6c0   : > { %v991_v57 = vsel %vm987_vm10, %v2189_v6, -inf  ;;  %v993_v9 = vsel %vm989_vm11, %v2201_v19, -inf }
 0x6c1   : > { %v997_v15 = vsel %vm509_vm13, %v991_v57, -inf  ;;  %v1003_v37 = vsel %vm509_vm13, %v993_v9, -inf }
 0x6c2   : > { %998 = vmax.xlane.f32.xlu0 %v997_v15  ;;  %1004 = vmax.xlane.f32.xlu2 %v1003_v37 }
 0x6c6   : > { %v2515_v28 = vpop.xlane.xlu0 %965 }
 0x6c7   : > { %3320 = vst [vmem:[#allocation15_spill] sm:$0xff] %v2515_v28  ;;  %vm988_vm12 = vcmp.lt.f32.partialorder %v2203_v20, %v2515_v28 }
 0x6c8   : > { %v992_v42 = vsel %vm988_vm12, %v2203_v20, -inf }
 0x6c9   : > { %v1000_v62 = vsel %vm509_vm13, %v992_v42, -inf }
 0x6ca   : > { %1001 = vmax.xlane.f32.xlu1 %v1000_v62 }
 0x72d   : > { %v2521_v55 = vpop.xlane.xlu2 %995 }
 0x72e   : > { %vm1022_vm14 = vcmp.lt.f32.partialorder %v2187_v5, %v2521_v55 }
 0x72f   : > { %v1026_v57 = vsel %vm1022_vm14, %v2187_v5, -inf }
 0x730   : > { %v1030_v9 = vsel %vm509_vm13, %v1026_v57, -inf }
 0x731   : > { %1031 = vmax.xlane.f32.xlu0 %v1030_v9 }
 0x735   : > { %v2527_v37 = vpop.xlane.xlu2 %1004  ;;  %v2529_v15 = vpop.xlane.xlu0 %998 }
 0x736   : > { %3321 = vst [vmem:[#allocation16_spill] sm:$0xff] %v2527_v37  ;;  %vm1025_vm15 = vcmp.lt.f32.partialorder %v2201_v19, %v2527_v37  ;;  %vm1023_vm1 = vcmp.lt.f32.partialorder %v2189_v6, %v2529_v15 }
 0x737   : > { %3322 = vst [vmem:[#allocation17_spill] sm:$0xff] %v2529_v15  ;;  %v1029_v62 = vsel %vm1025_vm15, %v2201_v19, -inf  ;;  %v1027_v42 = vsel %vm1023_vm1, %v2189_v6, -inf }
 0x738   : > { %v1039_v28 = vsel %vm509_vm13, %v1029_v62, -inf  ;;  %v1033_v45 = vsel %vm509_vm13, %v1027_v42, -inf }
 0x739   : > { %1040 = vmax.xlane.f32.xlu0 %v1039_v28  ;;  %1034 = vmax.xlane.f32.xlu1 %v1033_v45 }
 0x73d   : > { %v2539_v57 = vpop.xlane.xlu1 %1001 }
 0x73e   : > { %3323 = vst [vmem:[#allocation18_spill] sm:$0xff] %v2539_v57  ;;  %vm1024_vm2 = vcmp.lt.f32.partialorder %v2203_v20, %v2539_v57 }
 0x73f   : > { %v1028_v9 = vsel %vm1024_vm2, %v2203_v20, -inf }
 0x740   : > { %v1036_v37 = vsel %vm509_vm13, %v1028_v9, -inf }
 0x741   : > { %1037 = vmax.xlane.f32.xlu2 %v1036_v37 }
 0x7a4   : > { %v2545_v2 = vpop.xlane.xlu0 %1031 }
 0x7a5   : > { %vm1058_vm3 = vcmp.lt.f32.partialorder %v2187_v5, %v2545_v2 }
 0x7a6   : > { %v1062_v62 = vsel %vm1058_vm3, %v2187_v5, -inf }
 0x7a7   : > { %v1066_v28 = vsel %vm509_vm13, %v1062_v62, -inf }
 0x7a8   : > { %1067 = vmax.xlane.f32.xlu1 %v1066_v28 }
 0x7ac   : > { %v2551_v45 = vpop.xlane.xlu1 %1034  ;;  %v2553_v42 = vpop.xlane.xlu0 %1040 }
 0x7ad   : > { %3324 = vst [vmem:[#allocation19_spill] sm:$0xff] %v2551_v45  ;;  %vm1059_vm4 = vcmp.lt.f32.partialorder %v2189_v6, %v2551_v45  ;;  %vm1061_vm5 = vcmp.lt.f32.partialorder %v2201_v19, %v2553_v42  ;;  %v2031_v45 = vld [vmem:[%s2112_s9] sm:$0xff] }
 0x7ae   : > { %3325 = vst [vmem:[#allocation20_spill] sm:$0xff] %v2553_v42  ;;  %v1063_v37 = vsel %vm1059_vm4, %v2189_v6, -inf  ;;  %v1065_v9 = vsel %vm1061_vm5, %v2201_v19, -inf }
 0x7af   : > { %v1069_v57 = vsel %vm509_vm13, %v1063_v37, -inf  ;;  %v1075_v7 = vsel %vm509_vm13, %v1065_v9, -inf }
 0x7b0   : > { %1070 = vmax.xlane.f32.xlu2 %v1069_v57  ;;  %1076 = vmax.xlane.f32.xlu1 %v1075_v7 }
 0x7b4   : > { %v2563_v62 = vpop.xlane.xlu2 %1037 }
 0x7b5   : > { %3326 = vst [vmem:[#allocation21_spill] sm:$0xff] %v2563_v62  ;;  %vm1060_vm6 = vcmp.lt.f32.partialorder %v2203_v20, %v2563_v62 }
 0x7b6   : > { %v1064_v28 = vsel %vm1060_vm6, %v2203_v20, -inf }
 0x7b7   : > { %v1072_v22 = vsel %vm509_vm13, %v1064_v28, -inf }
 0x7b8   : > { %1073 = vmax.xlane.f32.xlu0 %v1072_v22 }
 0x81b   : > { %v2569_v42 = vpop.xlane.xlu1 %1067 }
 0x81c   : > { %vm1094_vm7 = vcmp.lt.f32.partialorder %v2187_v5, %v2569_v42 }
 0x81d   : > { %v1098_v37 = vsel %vm1094_vm7, %v2187_v5, -inf }
 0x81e   : > { %v1102_v57 = vsel %vm509_vm13, %v1098_v37, -inf }
 0x81f   : > { %1103 = vmax.xlane.f32.xlu2 %v1102_v57 }
 0x823   : > { %v2575_v7 = vpop.xlane.xlu2 %1070  ;;  %v2577_v9 = vpop.xlane.xlu1 %1076 }
 0x824   : > { %3327 = vst [vmem:[#allocation22_spill] sm:$0xff] %v2575_v7  ;;  %vm1095_vm8 = vcmp.lt.f32.partialorder %v2189_v6, %v2575_v7  ;;  %vm1097_vm9 = vcmp.lt.f32.partialorder %v2201_v19, %v2577_v9 }
 0x825   : > { %3328 = vst [vmem:[#allocation23_spill] sm:$0xff] %v2577_v9  ;;  %v1099_v22 = vsel %vm1095_vm8, %v2189_v6, -inf  ;;  %v1101_v28 = vsel %vm1097_vm9, %v2201_v19, -inf }
 0x826   : > { %v1105_v62 = vsel %vm509_vm13, %v1099_v22, -inf  ;;  %v1111_v41 = vsel %vm509_vm13, %v1101_v28, -inf }
 0x827   : > { %1106 = vmax.xlane.f32.xlu0 %v1105_v62  ;;  %1112 = vmax.xlane.f32.xlu2 %v1111_v41 }
 0x82b   : > { %v2587_v37 = vpop.xlane.xlu0 %1073 }
 0x82c   : > { %3329 = vst [vmem:[#allocation24_spill] sm:$0xff] %v2587_v37  ;;  %vm1096_vm10 = vcmp.lt.f32.partialorder %v2203_v20, %v2587_v37 }
 0x82d   : > { %v1100_v57 = vsel %vm1096_vm10, %v2203_v20, -inf }
 0x82e   : > { %v1108_v7 = vsel %vm509_vm13, %v1100_v57, -inf }
 0x82f   : > { %1109 = vmax.xlane.f32.xlu1 %v1108_v7 }
 0x892   : > { %v2593_v9 = vpop.xlane.xlu2 %1103 }
 0x893   : > { %vm1130_vm11 = vcmp.lt.f32.partialorder %v2187_v5, %v2593_v9 }
 0x894   : > { %v1134_v22 = vsel %vm1130_vm11, %v2187_v5, -inf }
 0x895   : > { %v1138_v62 = vsel %vm509_vm13, %v1134_v22, -inf }
 0x896   : > { %1139 = vmax.xlane.f32.xlu0 %v1138_v62 }
 0x89a   : > { %v2599_v41 = vpop.xlane.xlu2 %1112  ;;  %v2601_v28 = vpop.xlane.xlu0 %1106 }
 0x89b   : > { %3330 = vst [vmem:[#allocation25_spill] sm:$0xff] %v2599_v41  ;;  %vm1133_vm12 = vcmp.lt.f32.partialorder %v2201_v19, %v2599_v41  ;;  %vm1131_vm14 = vcmp.lt.f32.partialorder %v2189_v6, %v2601_v28 }
 0x89c   : > { %3331 = vst [vmem:[#allocation26_spill] sm:$0xff] %v2601_v28  ;;  %v1137_v7 = vsel %vm1133_vm12, %v2201_v19, -inf  ;;  %v1135_v57 = vsel %vm1131_vm14, %v2189_v6, -inf }
 0x89d   : > { %v1147_v37 = vsel %vm509_vm13, %v1137_v7, -inf  ;;  %v1141_v52 = vsel %vm509_vm13, %v1135_v57, -inf }
 0x89e   : > { %1148 = vmax.xlane.f32.xlu0 %v1147_v37  ;;  %1142 = vmax.xlane.f32.xlu1 %v1141_v52 }
 0x8a2   : > { %v2611_v22 = vpop.xlane.xlu1 %1109 }
 0x8a3   : > { %3332 = vst [vmem:[#allocation27_spill] sm:$0xff] %v2611_v22  ;;  %vm1132_vm15 = vcmp.lt.f32.partialorder %v2203_v20, %v2611_v22 }
 0x8a4   : > { %v1136_v62 = vsel %vm1132_vm15, %v2203_v20, -inf }
 0x8a5   : > { %v1144_v41 = vsel %vm509_vm13, %v1136_v62, -inf }
 0x8a6   : > { %1145 = vmax.xlane.f32.xlu2 %v1144_v41 }
 0x909   : > { %v2617_v28 = vpop.xlane.xlu0 %1139 }
 0x90a   : > { %3333 = vst [vmem:[#allocation28_spill] sm:$0xff] %v2617_v28  ;;  %vm1166_vm1 = vcmp.lt.f32.partialorder %v2187_v5, %v2617_v28 }
 0x90b   : > { %v1170_v7 = vsel %vm1166_vm1, %v2187_v5, -inf }
 0x90c   : > { %v1174_v37 = vsel %vm509_vm13, %v1170_v7, -inf }
 0x90d   : > { %1175 = vmax.xlane.f32.xlu1 %v1174_v37 }
 0x911   : > { %v2623_v52 = vpop.xlane.xlu1 %1142  ;;  %v2625_v57 = vpop.xlane.xlu0 %1148 }
 0x912   : > { %3334 = vst [vmem:[#allocation29_spill] sm:$0xff] %v2623_v52  ;;  %vm1167_vm2 = vcmp.lt.f32.partialorder %v2189_v6, %v2623_v52  ;;  %vm1169_vm3 = vcmp.lt.f32.partialorder %v2201_v19, %v2625_v57 }
 0x913   : > { %3335 = vst [vmem:[#allocation30_spill] sm:$0xff] %v2625_v57  ;;  %v1171_v41 = vsel %vm1167_vm2, %v2189_v6, -inf  ;;  %v1173_v62 = vsel %vm1169_vm3, %v2201_v19, -inf }
 0x914   : > { %v1177_v22 = vsel %vm509_vm13, %v1171_v41, -inf  ;;  %v1183_v10 = vsel %vm509_vm13, %v1173_v62, -inf }
 0x915   : > { %1178 = vmax.xlane.f32.xlu2 %v1177_v22  ;;  %1184 = vmax.xlane.f32.xlu1 %v1183_v10 }
 0x919   : > { %v2635_v7 = vpop.xlane.xlu2 %1145 }
 0x91a   : > { %3336 = vst [vmem:[#allocation31_spill] sm:$0xff] %v2635_v7  ;;  %vm1168_vm4 = vcmp.lt.f32.partialorder %v2203_v20, %v2635_v7 }
 0x91b   : > { %v1172_v37 = vsel %vm1168_vm4, %v2203_v20, -inf }
 0x91c   : > { %v1180_v52 = vsel %vm509_vm13, %v1172_v37, -inf }
 0x91d   : > { %1181 = vmax.xlane.f32.xlu0 %v1180_v52 }
 0x980   : > { %v2641_v57 = vpop.xlane.xlu1 %1175 }
 0x981   : > { %3337 = vst [vmem:[#allocation32_spill] sm:$0xff] %v2641_v57  ;;  %vm1202_vm5 = vcmp.lt.f32.partialorder %v2187_v5, %v2641_v57 }
 0x982   : > { %v1206_v41 = vsel %vm1202_vm5, %v2187_v5, -inf }
 0x983   : > { %v1210_v22 = vsel %vm509_vm13, %v1206_v41, -inf }
 0x984   : > { %1211 = vmax.xlane.f32.xlu2 %v1210_v22 }
 0x988   : > { %v2647_v10 = vpop.xlane.xlu2 %1178  ;;  %v2649_v62 = vpop.xlane.xlu1 %1184 }
 0x989   : > { %3338 = vst [vmem:[#allocation33_spill] sm:$0xff] %v2647_v10  ;;  %vm1203_vm6 = vcmp.lt.f32.partialorder %v2189_v6, %v2647_v10  ;;  %vm1205_vm7 = vcmp.lt.f32.partialorder %v2201_v19, %v2649_v62 }
 0x98a   : > { %3339 = vst [vmem:[#allocation34_spill] sm:$0xff] %v2649_v62  ;;  %v1207_v52 = vsel %vm1203_vm6, %v2189_v6, -inf  ;;  %v1209_v37 = vsel %vm1205_vm7, %v2201_v19, -inf }
 0x98b   : > { %v1213_v7 = vsel %vm509_vm13, %v1207_v52, -inf  ;;  %v1219_v25 = vsel %vm509_vm13, %v1209_v37, -inf }
 0x98c   : > { %1214 = vmax.xlane.f32.xlu0 %v1213_v7  ;;  %1220 = vmax.xlane.f32.xlu2 %v1219_v25 }
 0x990   : > { %v2659_v41 = vpop.xlane.xlu0 %1181 }
 0x991   : > { %3340 = vst [vmem:[#allocation35_spill] sm:$0xff] %v2659_v41  ;;  %vm1204_vm8 = vcmp.lt.f32.partialorder %v2203_v20, %v2659_v41 }
 0x992   : > { %v1208_v22 = vsel %vm1204_vm8, %v2203_v20, -inf }
 0x993   : > { %v1216_v10 = vsel %vm509_vm13, %v1208_v22, -inf }
 0x994   : > { %1217 = vmax.xlane.f32.xlu1 %v1216_v10 }
 0x9f7   : > { %v2665_v62 = vpop.xlane.xlu2 %1211 }
 0x9f8   : > { %3341 = vst [vmem:[#allocation36_spill] sm:$0xff] %v2665_v62  ;;  %vm1238_vm9 = vcmp.lt.f32.partialorder %v2187_v5, %v2665_v62 }
 0x9f9   : > { %v1242_v52 = vsel %vm1238_vm9, %v2187_v5, -inf }
 0x9fa   : > { %v1246_v7 = vsel %vm509_vm13, %v1242_v52, -inf }
 0x9fb   : > { %1247 = vmax.xlane.f32.xlu0 %v1246_v7 }
 0x9ff   : > { %v2671_v25 = vpop.xlane.xlu2 %1220  ;;  %v2673_v37 = vpop.xlane.xlu0 %1214 }
 0xa00   : > { %3342 = vst [vmem:[#allocation37_spill] sm:$0xff] %v2671_v25  ;;  %vm1241_vm10 = vcmp.lt.f32.partialorder %v2201_v19, %v2671_v25  ;;  %vm1239_vm11 = vcmp.lt.f32.partialorder %v2189_v6, %v2673_v37 }
 0xa01   : > { %3343 = vst [vmem:[#allocation38_spill] sm:$0xff] %v2673_v37  ;;  %v1245_v10 = vsel %vm1241_vm10, %v2201_v19, -inf  ;;  %v1243_v22 = vsel %vm1239_vm11, %v2189_v6, -inf }
 0xa02   : > { %v1255_v41 = vsel %vm509_vm13, %v1245_v10, -inf  ;;  %v1249_v62 = vsel %vm509_vm13, %v1243_v22, -inf }
 0xa03   : > { %1256 = vmax.xlane.f32.xlu0 %v1255_v41  ;;  %1250 = vmax.xlane.f32.xlu1 %v1249_v62 }
 0xa07   : > { %v2683_v52 = vpop.xlane.xlu1 %1217 }
 0xa08   : > { %3344 = vst [vmem:[#allocation39_spill] sm:$0xff] %v2683_v52  ;;  %vm1240_vm12 = vcmp.lt.f32.partialorder %v2203_v20, %v2683_v52 }
 0xa09   : > { %v1244_v7 = vsel %vm1240_vm12, %v2203_v20, -inf }
 0xa0a   : > { %v1252_v25 = vsel %vm509_vm13, %v1244_v7, -inf }
 0xa0b   : > { %1253 = vmax.xlane.f32.xlu2 %v1252_v25 }
 0xa6e   : > { %v2689_v37 = vpop.xlane.xlu0 %1247 }
 0xa6f   : > { %3345 = vst [vmem:[#allocation40_spill] sm:$0xff] %v2689_v37  ;;  %vm1274_vm14 = vcmp.lt.f32.partialorder %v2187_v5, %v2689_v37 }
 0xa70   : > { %v1278_v10 = vsel %vm1274_vm14, %v2187_v5, -inf }
 0xa71   : > { %v1282_v41 = vsel %vm509_vm13, %v1278_v10, -inf }
 0xa72   : > { %1283 = vmax.xlane.f32.xlu1 %v1282_v41 }
 0xa76   : > { %v2695_v62 = vpop.xlane.xlu1 %1250  ;;  %v2697_v22 = vpop.xlane.xlu0 %1256 }
 0xa77   : > { %3346 = vst [vmem:[#allocation41_spill] sm:$0xff] %v2695_v62  ;;  %vm1275_vm15 = vcmp.lt.f32.partialorder %v2189_v6, %v2695_v62  ;;  %vm1277_vm1 = vcmp.lt.f32.partialorder %v2201_v19, %v2697_v22 }
 0xa78   : > { %3347 = vst [vmem:[#allocation42_spill] sm:$0xff] %v2697_v22  ;;  %v1279_v25 = vsel %vm1275_vm15, %v2189_v6, -inf  ;;  %v1281_v7 = vsel %vm1277_vm1, %v2201_v19, -inf }
 0xa79   : > { %v1285_v52 = vsel %vm509_vm13, %v1279_v25, -inf  ;;  %v1291_v37 = vsel %vm509_vm13, %v1281_v7, -inf }
 0xa7a   : > { %1286 = vmax.xlane.f32.xlu2 %v1285_v52  ;;  %1292 = vmax.xlane.f32.xlu1 %v1291_v37 }
 0xa7e   : > { %v2707_v10 = vpop.xlane.xlu2 %1253 }
 0xa7f   : > { %3348 = vst [vmem:[#allocation43_spill] sm:$0xff] %v2707_v10  ;;  %vm1276_vm2 = vcmp.lt.f32.partialorder %v2203_v20, %v2707_v10 }
 0xa80   : > { %v1280_v41 = vsel %vm1276_vm2, %v2203_v20, -inf }
 0xa81   : > { %v1288_v62 = vsel %vm509_vm13, %v1280_v41, -inf }
 0xa82   : > { %1289 = vmax.xlane.f32.xlu0 %v1288_v62 }
 0xae5   : > { %v2713_v22 = vpop.xlane.xlu1 %1283 }
 0xae6   : > { %3349 = vst [vmem:[#allocation44_spill] sm:$0xff] %v2713_v22  ;;  %vm1310_vm3 = vcmp.lt.f32.partialorder %v2187_v5, %v2713_v22 }
 0xae7   : > { %v1314_v25 = vsel %vm1310_vm3, %v2187_v5, -inf }
 0xae8   : > { %v1318_v52 = vsel %vm509_vm13, %v1314_v25, -inf }
 0xae9   : > { %1319 = vmax.xlane.f32.xlu2 %v1318_v52 }
 0xaed   : > { %v2719_v37 = vpop.xlane.xlu2 %1286  ;;  %v2721_v7 = vpop.xlane.xlu1 %1292 }
 0xaee   : > { %3350 = vst [vmem:[#allocation45_spill] sm:$0xff] %v2719_v37  ;;  %vm1311_vm4 = vcmp.lt.f32.partialorder %v2189_v6, %v2719_v37  ;;  %vm1313_vm5 = vcmp.lt.f32.partialorder %v2201_v19, %v2721_v7 }
 0xaef   : > { %3351 = vst [vmem:[#allocation46_spill] sm:$0xff] %v2721_v7  ;;  %v1315_v62 = vsel %vm1311_vm4, %v2189_v6, -inf  ;;  %v1317_v41 = vsel %vm1313_vm5, %v2201_v19, -inf }
 0xaf0   : > { %v1321_v10 = vsel %vm509_vm13, %v1315_v62, -inf  ;;  %v1327_v22 = vsel %vm509_vm13, %v1317_v41, -inf }
 0xaf1   : > { %1322 = vmax.xlane.f32.xlu0 %v1321_v10  ;;  %1328 = vmax.xlane.f32.xlu2 %v1327_v22 }
 0xaf5   : > { %v2731_v25 = vpop.xlane.xlu0 %1289 }
 0xaf6   : > { %3352 = vst [vmem:[#allocation47_spill] sm:$0xff] %v2731_v25  ;;  %vm1312_vm6 = vcmp.lt.f32.partialorder %v2203_v20, %v2731_v25 }
 0xaf7   : > { %v1316_v52 = vsel %vm1312_vm6, %v2203_v20, -inf }
 0xaf8   : > { %v1324_v37 = vsel %vm509_vm13, %v1316_v52, -inf }
 0xaf9   : > { %1325 = vmax.xlane.f32.xlu1 %v1324_v37 }
 0xb5c   : > { %v2737_v7 = vpop.xlane.xlu2 %1319 }
 0xb5d   : > { %3353 = vst [vmem:[#allocation48_spill] sm:$0xff] %v2737_v7  ;;  %vm1346_vm7 = vcmp.lt.f32.partialorder %v2187_v5, %v2737_v7 }
 0xb5e   : > { %v1350_v62 = vsel %vm1346_vm7, %v2187_v5, -inf }
 0xb5f   : > { %v1354_v10 = vsel %vm509_vm13, %v1350_v62, -inf }
 0xb60   : > { %1355 = vmax.xlane.f32.xlu0 %v1354_v10 }
 0xb64   : > { %v2743_v22 = vpop.xlane.xlu2 %1328  ;;  %v2745_v41 = vpop.xlane.xlu0 %1322 }
 0xb65   : > { %3354 = vst [vmem:[#allocation49_spill] sm:$0xff] %v2743_v22  ;;  %vm1349_vm8 = vcmp.lt.f32.partialorder %v2201_v19, %v2743_v22  ;;  %vm1347_vm9 = vcmp.lt.f32.partialorder %v2189_v6, %v2745_v41 }
 0xb66   : > { %3355 = vst [vmem:[#allocation50_spill] sm:$0xff] %v2745_v41  ;;  %v1353_v37 = vsel %vm1349_vm8, %v2201_v19, -inf  ;;  %v1351_v52 = vsel %vm1347_vm9, %v2189_v6, -inf }
 0xb67   : > { %v1363_v25 = vsel %vm509_vm13, %v1353_v37, -inf  ;;  %v1357_v7 = vsel %vm509_vm13, %v1351_v52, -inf }
 0xb68   : > { %1364 = vmax.xlane.f32.xlu0 %v1363_v25  ;;  %1358 = vmax.xlane.f32.xlu1 %v1357_v7 }
 0xb6c   : > { %v2755_v62 = vpop.xlane.xlu1 %1325 }
 0xb6d   : > { %3356 = vst [vmem:[#allocation51_spill] sm:$0xff] %v2755_v62  ;;  %vm1348_vm10 = vcmp.lt.f32.partialorder %v2203_v20, %v2755_v62 }
 0xb6e   : > { %v1352_v10 = vsel %vm1348_vm10, %v2203_v20, -inf }
 0xb6f   : > { %v1360_v22 = vsel %vm509_vm13, %v1352_v10, -inf }
 0xb70   : > { %1361 = vmax.xlane.f32.xlu2 %v1360_v22 }
 0xbd3   : > { %v2761_v41 = vpop.xlane.xlu0 %1355 }
 0xbd4   : > { %3357 = vst [vmem:[#allocation52_spill] sm:$0xff] %v2761_v41  ;;  %vm1382_vm11 = vcmp.lt.f32.partialorder %v2187_v5, %v2761_v41 }
 0xbd5   : > { %v1386_v37 = vsel %vm1382_vm11, %v2187_v5, -inf }
 0xbd6   : > { %v1390_v25 = vsel %vm509_vm13, %v1386_v37, -inf }
 0xbd7   : > { %1391 = vmax.xlane.f32.xlu1 %v1390_v25 }
 0xbdb   : > { %v2767_v7 = vpop.xlane.xlu1 %1358  ;;  %v2769_v52 = vpop.xlane.xlu0 %1364 }
 0xbdc   : > { %3358 = vst [vmem:[#allocation53_spill] sm:$0xff] %v2767_v7  ;;  %vm1383_vm12 = vcmp.lt.f32.partialorder %v2189_v6, %v2767_v7  ;;  %vm1385_vm14 = vcmp.lt.f32.partialorder %v2201_v19, %v2769_v52 }
 0xbdd   : > { %3359 = vst [vmem:[#allocation54_spill] sm:$0xff] %v2769_v52  ;;  %v1387_v22 = vsel %vm1383_vm12, %v2189_v6, -inf  ;;  %v1389_v10 = vsel %vm1385_vm14, %v2201_v19, -inf }
 0xbde   : > { %v1393_v62 = vsel %vm509_vm13, %v1387_v22, -inf  ;;  %v1399_v41 = vsel %vm509_vm13, %v1389_v10, -inf }
 0xbdf   : > { %1394 = vmax.xlane.f32.xlu2 %v1393_v62  ;;  %1400 = vmax.xlane.f32.xlu1 %v1399_v41 }
 0xbe3   : > { %v2779_v37 = vpop.xlane.xlu2 %1361 }
 0xbe4   : > { %3360 = vst [vmem:[#allocation55_spill] sm:$0xff] %v2779_v37  ;;  %vm1384_vm15 = vcmp.lt.f32.partialorder %v2203_v20, %v2779_v37 }
 0xbe5   : > { %v1388_v25 = vsel %vm1384_vm15, %v2203_v20, -inf }
 0xbe6   : > { %v1396_v7 = vsel %vm509_vm13, %v1388_v25, -inf }
 0xbe7   : > { %1397 = vmax.xlane.f32.xlu0 %v1396_v7 }
 0xc4a   : > { %v2785_v52 = vpop.xlane.xlu1 %1391 }
 0xc4b   : > { %3361 = vst [vmem:[#allocation56_spill] sm:$0xff] %v2785_v52  ;;  %vm1418_vm1 = vcmp.lt.f32.partialorder %v2187_v5, %v2785_v52 }
 0xc4c   : > { %v1422_v22 = vsel %vm1418_vm1, %v2187_v5, -inf }
 0xc4d   : > { %v1426_v62 = vsel %vm509_vm13, %v1422_v22, -inf }
 0xc4e   : > { %1427 = vmax.xlane.f32.xlu2 %v1426_v62 }
 0xc52   : > { %v2791_v41 = vpop.xlane.xlu2 %1394  ;;  %v2793_v10 = vpop.xlane.xlu1 %1400 }
 0xc53   : > { %3362 = vst [vmem:[#allocation57_spill] sm:$0xff] %v2791_v41  ;;  %vm1419_vm2 = vcmp.lt.f32.partialorder %v2189_v6, %v2791_v41  ;;  %vm1421_vm3 = vcmp.lt.f32.partialorder %v2201_v19, %v2793_v10 }
 0xc54   : > { %3363 = vst [vmem:[#allocation58_spill] sm:$0xff] %v2793_v10  ;;  %v1423_v7 = vsel %vm1419_vm2, %v2189_v6, -inf  ;;  %v1425_v25 = vsel %vm1421_vm3, %v2201_v19, -inf }
 0xc55   : > { %v1429_v37 = vsel %vm509_vm13, %v1423_v7, -inf  ;;  %v1435_v52 = vsel %vm509_vm13, %v1425_v25, -inf }
 0xc56   : > { %1430 = vmax.xlane.f32.xlu0 %v1429_v37  ;;  %1436 = vmax.xlane.f32.xlu2 %v1435_v52 }
 0xc5a   : > { %v2803_v22 = vpop.xlane.xlu0 %1397 }
 0xc5b   : > { %3364 = vst [vmem:[#allocation59_spill] sm:$0xff] %v2803_v22  ;;  %vm1420_vm4 = vcmp.lt.f32.partialorder %v2203_v20, %v2803_v22 }
 0xc5c   : > { %v1424_v62 = vsel %vm1420_vm4, %v2203_v20, -inf }
 0xc5d   : > { %v1432_v41 = vsel %vm509_vm13, %v1424_v62, -inf }
 0xc5e   : > { %1433 = vmax.xlane.f32.xlu1 %v1432_v41 }
 0xcc1   : > { %v2809_v10 = vpop.xlane.xlu2 %1427 }
 0xcc2   : > { %3365 = vst [vmem:[#allocation60_spill] sm:$0xff] %v2809_v10  ;;  %vm1454_vm5 = vcmp.lt.f32.partialorder %v2187_v5, %v2809_v10 }
 0xcc3   : > { %v1458_v7 = vsel %vm1454_vm5, %v2187_v5, -inf }
 0xcc4   : > { %v1462_v37 = vsel %vm509_vm13, %v1458_v7, -inf }
 0xcc5   : > { %1463 = vmax.xlane.f32.xlu0 %v1462_v37 }
 0xcc9   : > { %v2815_v52 = vpop.xlane.xlu2 %1436  ;;  %v2817_v25 = vpop.xlane.xlu0 %1430 }
 0xcca   : > { %3366 = vst [vmem:[#allocation61_spill] sm:$0xff] %v2815_v52  ;;  %vm1457_vm6 = vcmp.lt.f32.partialorder %v2201_v19, %v2815_v52  ;;  %vm1455_vm7 = vcmp.lt.f32.partialorder %v2189_v6, %v2817_v25 }
 0xccb   : > { %3367 = vst [vmem:[#allocation62_spill] sm:$0xff] %v2817_v25  ;;  %v1461_v41 = vsel %vm1457_vm6, %v2201_v19, -inf  ;;  %v1459_v62 = vsel %vm1455_vm7, %v2189_v6, -inf }
 0xccc   : > { %v1471_v22 = vsel %vm509_vm13, %v1461_v41, -inf  ;;  %v1465_v7 = vsel %vm509_vm13, %v1459_v62, -inf }
 0xccd   : > { %1472 = vmax.xlane.f32.xlu0 %v1471_v22  ;;  %1466 = vmax.xlane.f32.xlu1 %v1465_v7 }
 0xcd1   : > { %v2827_v37 = vpop.xlane.xlu1 %1433 }
 0xcd2   : > { %3368 = vst [vmem:[#allocation63_spill] sm:$0xff] %v2827_v37  ;;  %vm1456_vm8 = vcmp.lt.f32.partialorder %v2203_v20, %v2827_v37 }
 0xcd3   : > { %v1460_v52 = vsel %vm1456_vm8, %v2203_v20, -inf }
 0xcd4   : > { %v1468_v25 = vsel %vm509_vm13, %v1460_v52, -inf }
 0xcd5   : > { %1469 = vmax.xlane.f32.xlu2 %v1468_v25 }
 0xd38   : > { %v2833_v10 = vpop.xlane.xlu0 %1463 }
 0xd39   : > { %3369 = vst [vmem:[#allocation64_spill] sm:$0xff] %v2833_v10  ;;  %vm1490_vm9 = vcmp.lt.f32.partialorder %v2187_v5, %v2833_v10  ;;  %v368_v10 = vld [vmem:[%s365_s10 + $0x10] sm:$0xff] }
 0xd3a   : > { %v1494_v41 = vsel %vm1490_vm9, %v2187_v5, -inf }
 0xd3b   : > { %v1498_v22 = vsel %vm509_vm13, %v1494_v41, -inf  ;;  %v366_v41 = vld [vmem:[%s365_s10] sm:$0xff] }
 0xd3c   : > { %1499 = vmax.xlane.f32.xlu1 %v1498_v22  ;;  %v370_v57 = vmul.f32 %v2031_v45, %v366_v41  ;;  %v2033_v45 = vld [vmem:[%s2112_s9 + $0x8] sm:$0xff] }
 0xd40   : > { %v2844_v52 = vpop.xlane.xlu1 %1466  ;;  %v2846_v25 = vpop.xlane.xlu0 %1472 }
 0xd41   : > { %3370 = vst [vmem:[#allocation65_spill] sm:$0xff] %v2844_v52  ;;  %vm1491_vm10 = vcmp.lt.f32.partialorder %v2189_v6, %v2844_v52  ;;  %vm1493_vm11 = vcmp.lt.f32.partialorder %v2201_v19, %v2846_v25  ;;  %v2032_v52 = vld [vmem:[%s2112_s9 + $0x10] sm:$0xff] }
 0xd42   : > { %3371 = vst [vmem:[#allocation66_spill] sm:$0xff] %v2846_v25  ;;  %v1495_v62 = vsel %vm1491_vm10, %v2189_v6, -inf  ;;  %v1497_v7 = vsel %vm1493_vm11, %v2201_v19, -inf  ;;  %v372_v54 = vmul.f32 %v2032_v52, %v368_v10  ;;  %v374_v25 = vsel %vm307_vm0, %v370_v57, 0.0  ;;  %v2034_v52 = vld [vmem:[%s2112_s9 + $0x18] sm:$0xff] }
 0xd43   : > { %v1501_v22 = vsel %vm509_vm13, %v1495_v62, -inf  ;;  %v1507_v37 = vsel %vm509_vm13, %v1497_v7, -inf  ;;  %v371_v10 = vmul.f32 %v2033_v45, %v367_v63 }
 0xd44   : > { %1502 = vmax.xlane.f32.xlu2 %v1501_v22  ;;  %1508 = vmax.xlane.f32.xlu1 %v1507_v37  ;;  %v380_v7 = vsel %vm307_vm0, %v372_v54, 0.0  ;;  %v369_v22 = vld [vmem:[%s365_s10 + $0x18] sm:$0xff] }
 0xd45   : > { %v373_v41 = vmul.f32 %v2034_v52, %v369_v22  ;;  %v377_v28 = vsel %vm307_vm0, %v371_v10, 0.0 }
 0xd48   : > { %v2858_v15 = vpop.xlane.xlu2 %1469 }
 0xd49   : > { %3372 = vst [vmem:[#allocation67_spill] sm:$0xff] %v2858_v15  ;;  %vm1492_vm12 = vcmp.lt.f32.partialorder %v2203_v20, %v2858_v15  ;;  %v383_v15 = vsel %vm307_vm0, %v373_v41, 0.0 }
 0xd4a   : > { %v1496_v62 = vsel %vm1492_vm12, %v2203_v20, -inf }
 0xd4b   : > { %v1504_v37 = vsel %vm509_vm13, %v1496_v62, -inf }
 0xd4c   : > { %1505 = vmax.xlane.f32.xlu0 %v1504_v37  ;;  %375 = vadd.xlane.f32.xlu2 %v374_v25 }
 0xd4d   : > { %381 = vadd.xlane.f32.xlu1 %v380_v7 }
 0xd54   : > { %378 = vadd.xlane.f32.xlu0 %v377_v28  ;;  %384 = vadd.xlane.f32.xlu2 %v383_v15 }
 0xdaf   : > { %v2870_v57 = vpop.xlane.xlu1 %1499 }
 0xdb0   : > { %vm1526_vm14 = vcmp.lt.f32.partialorder %v2187_v5, %v2870_v57 }
 0xdb1   : > { %v1530_v54 = vsel %vm1526_vm14, %v2187_v5, -inf }
 0xdb2   : > { %v1534_v25 = vsel %vm509_vm13, %v1530_v54, -inf  ;;  %v390_v54 = vld [vmem:[%s2898_s11] sm:$0xff] }
 0xdb3   : > { %1535 = vmax.xlane.f32.xlu0 %v1534_v25 }
 0xdb7   : > { %v2876_v62 = vpop.xlane.xlu2 %1502  ;;  %v2878_v63 = vpop.xlane.xlu1 %1508 }
 0xdb8   : > { %3373 = vst [vmem:[#allocation68_spill] sm:$0xff] %v2876_v62  ;;  %vm1527_vm0 = vcmp.lt.f32.partialorder %v2189_v6, %v2876_v62  ;;  %vm1529_vm15 = vcmp.lt.f32.partialorder %v2201_v19, %v2878_v63 }
 0xdb9   : > { %3374 = vst [vmem:[#allocation69_spill] sm:$0xff] %v2878_v63  ;;  %v1531_v15 = vsel %vm1527_vm0, %v2189_v6, -inf  ;;  %v1533_v28 = vsel %vm1529_vm15, %v2201_v19, -inf  ;;  %v391_v63 = vld [vmem:[%s2898_s11 + $0x8] sm:$0xff] }
 0xdba   : > { %v1537_v7 = vsel %vm509_vm13, %v1531_v15, -inf  ;;  %v1543_v22 = vsel %vm509_vm13, %v1533_v28, -inf }
 0xdbb   : > { %1538 = vmax.xlane.f32.xlu1 %v1537_v7  ;;  %1544 = vmax.xlane.f32.xlu0 %v1543_v22 }
 0xdbf   : > { %v2888_v37 = vpop.xlane.xlu0 %1505  ;;  %v376_v52 = vpop.xlane.xlu2 %375 }
 0xdc0   : > { %3375 = vst [vmem:[#allocation70_spill] sm:$0xff] %v2888_v37  ;;  %vm1528_vm1 = vcmp.lt.f32.partialorder %v2203_v20, %v2888_v37  ;;  %v386_v41 = vmul.f32 %v376_v52, %v2181_v59 }
 0xdc1   : > { %v1532_v45 = vsel %vm1528_vm1, %v2203_v20, -inf }
 0xdc2   : > { %v1540_v10 = vsel %vm509_vm13, %v1532_v45, -inf  ;;  %v2902_v25 = vmul.f32 %v390_v54, %v386_v41  ;;  %v2918_v41 = vpop.xlane.xlu1 %381 }
 0xdc3   : > { %1541 = vmax.xlane.f32.xlu2 %v1540_v10 }
 0xdc4   : > { %3376 = vst [vmem:[#allocation71_spill] sm:$0xff] %v2902_v25  ;;  %v2906_v28 = vmax.f32 %v2902_v25, %v2209_v23 }
 0xdc6   : > { %v526_v7 = vsub.f32 %v2902_v25, %v2906_v28  ;;  %v538_v45 = vsub.f32 %v2209_v23, %v2906_v28  ;;  %v574_v25 = vsub.f32 %v2233_v35, %v2906_v28 }
 0xdc7   : > { %v379_v15 = vpop.xlane.xlu0 %378 }
 0xdc8   : > { %v530_v52 = vmul.f32 1.442695, %v526_v7  ;;  %v542_v54 = vmul.f32 1.442695, %v538_v45  ;;  %v387_v37 = vmul.f32 %v379_v15, %v2183_v61  ;;  %v578_v62 = vmul.f32 1.442695, %v574_v25 }
 0xdca   : > { %1775 = vpow2.f32 %v530_v52  ;;  %v2924_v23 = vmul.f32 %v391_v63, %v387_v37  ;;  %v646_v63 = vsub.f32 %v2281_v60, %v2906_v28  ;;  %v682_v60 = vsub.f32 %v2305_v12, %v2906_v28 }
 0xdcb   : > { %1777 = vpow2.f32 %v542_v54 }
 0xdcc   : > { %3377 = vst [vmem:[#allocation72_spill] sm:$0xff] %v2924_v23  ;;  %v2932_v7 = vmax.f32 %v2924_v23, %v2213_v24  ;;  %1779 = vpow2.f32 %v578_v62  ;;  %v650_v52 = vmul.f32 1.442695, %v646_v63 }
 0xdce   : > { %v539_v25 = vsub.f32 %v2213_v24, %v2932_v7  ;;  %v686_v24 = vmul.f32 1.442695, %v682_v60 }
 0xdd0   : > { %v1776_v61 = vpop.eup %1775 }
 0xdd1   : > { %v1778_v15 = vpop.eup %1777 }
 0xdd2   : > { %v550_v37 = vadd.f32 %v1778_v15, %v1776_v61  ;;  %v544_v15 = vmul.f32 1.442695, %v539_v25 }
 0xe26   : > { %v2910_v22 = vpop.xlane.xlu0 %1535 }
 0xe27   : > { %vm1562_vm2 = vcmp.lt.f32.partialorder %v2187_v5, %v2910_v22 }
 0xe28   : > { %v1566_v59 = vsel %vm1562_vm2, %v2187_v5, -inf  ;;  %v610_v5 = vsub.f32 %v2257_v47, %v2906_v28  ;;  %v527_v47 = vsub.f32 %v2924_v23, %v2932_v7 }
 0xe29   : > { %v1570_v10 = vsel %vm509_vm13, %v1566_v59, -inf }
 0xe2a   : > { %1571 = vmax.xlane.f32.xlu1 %v1570_v10  ;;  %v614_v35 = vmul.f32 1.442695, %v610_v5  ;;  %v532_v23 = vmul.f32 1.442695, %v527_v47  ;;  %v754_v47 = vsub.f32 %v2353_v48, %v2906_v28  ;;  %v647_v48 = vsub.f32 %v2287_v0, %v2932_v7 }
 0xe2b   : > { %v388_v0 = vmul.f32 %v2918_v41, %v2195_v11 }
 0xe2c   : > { %1781 = vpow2.f32 %v614_v35 }
 0xe2d   : > { %1783 = vpow2.f32 %v650_v52 }
 0xe2e   : > { %v2928_v59 = vpop.xlane.xlu1 %1538  ;;  %v2934_v45 = vpop.xlane.xlu0 %1544  ;;  %1785 = vpow2.f32 %v532_v23 }
 0xe2f   : > { %3378 = vst [vmem:[#allocation73_spill] sm:$0xff] %v2934_v45  ;;  %vm1563_vm3 = vcmp.lt.f32.partialorder %v2189_v6, %v2928_v59  ;;  %vm1565_vm4 = vcmp.lt.f32.partialorder %v2201_v19, %v2934_v45  ;;  %v1780_v45 = vpop.eup %1779  ;;  %1787 = vpow2.f32 %v544_v15  ;;  %v385_v23 = vpop.xlane.xlu2 %384  ;;  %v826_v15 = vsub.f32 %v2401_v32, %v2906_v28 }
 0xe30   : > { %v1567_v10 = vsel %vm1563_vm3, %v2189_v6, -inf  ;;  %v1569_v62 = vsel %vm1565_vm4, %v2201_v19, -inf  ;;  %v586_v61 = vadd.f32 %v1780_v45, %v550_v37  ;;  %v718_v6 = vsub.f32 %v2329_v31, %v2906_v28 }
 0xe31   : > { %v1573_v54 = vsel %vm509_vm13, %v1567_v10, -inf  ;;  %v1579_v5 = vsel %vm509_vm13, %v1569_v62, -inf  ;;  %v575_v19 = vsub.f32 %v2239_v38, %v2932_v7  ;;  %1789 = vpow2.f32 %v686_v24  ;;  %v393_v24 = vld [vmem:[%s2898_s11 + $0x18] sm:$0xff] }
 0xe32   : > { %1574 = vmax.xlane.f32.xlu2 %v1573_v54  ;;  %1580 = vmax.xlane.f32.xlu1 %v1579_v5  ;;  %v1782_v35 = vpop.eup %1781  ;;  %v722_v63 = vmul.f32 1.442695, %v718_v6  ;;  %v611_v45 = vsub.f32 %v2263_v50, %v2932_v7  ;;  %v758_v62 = vmul.f32 1.442695, %v754_v47  ;;  %v790_v38 = vsub.f32 %v2377_v4, %v2906_v28  ;;  %v392_v47 = vld [vmem:[%s2898_s11 + $0x10] sm:$0xff] }
 0xe33   : > { %v622_v12 = vadd.f32 %v1782_v35, %v586_v61  ;;  %v580_v10 = vmul.f32 1.442695, %v575_v19  ;;  %v1784_v37 = vpop.eup %1783  ;;  %v389_v50 = vmul.f32 %v385_v23, %v2197_v13  ;;  %v652_v4 = vmul.f32 1.442695, %v647_v48 }
 0xe34   : > { %v1786_v31 = vpop.eup %1785  ;;  %1791 = vpow2.f32 %v722_v63  ;;  %v616_v60 = vmul.f32 1.442695, %v611_v45  ;;  %v794_v61 = vmul.f32 1.442695, %v790_v38  ;;  %v683_v19 = vsub.f32 %v2313_v17, %v2932_v7 }
 0xe35   : > { %v658_v25 = vadd.f32 %v1784_v37, %v622_v12  ;;  %v1788_v52 = vpop.eup %1787  ;;  %1793 = vpow2.f32 %v580_v10  ;;  %v2973_v13 = vmul.f32 %v393_v24, %v389_v50  ;;  %v830_v10 = vmul.f32 1.442695, %v826_v15 }
 0xe36   : > { %1795 = vpow2.f32 %v758_v62  ;;  %v551_v6 = vadd.f32 %v1788_v52, %v1786_v31  ;;  %v862_v32 = vsub.f32 %v2425_v58, %v2906_v28  ;;  %v688_v37 = vmul.f32 1.442695, %v683_v19 }
 0xe37   : > { %v1790_v54 = vpop.eup %1789  ;;  %1797 = vpow2.f32 %v616_v60  ;;  %v719_v17 = vsub.f32 %v2335_v34, %v2932_v7  ;;  %v2979_v31 = vmul.f32 %v392_v47, %v388_v0  ;;  %v2983_v62 = vmax.f32 %v2973_v13, %v2219_v27 }
 0xe38   : > { %v694_v5 = vadd.f32 %v1790_v54, %v658_v25  ;;  %1799 = vpow2.f32 %v794_v61  ;;  %v866_v38 = vmul.f32 1.442695, %v862_v32  ;;  %v898_v58 = vsub.f32 %v2449_v33, %v2906_v28 }
 0xe39   : > { %1801 = vpow2.f32 %v652_v4  ;;  %v724_v52 = vmul.f32 1.442695, %v719_v17  ;;  %v755_v34 = vsub.f32 %v2359_v53, %v2932_v7  ;;  %v934_v48 = vsub.f32 %v2473_v18, %v2906_v28 }
 0xe3a   : > { %v1792_v35 = vpop.eup %1791  ;;  %1803 = vpow2.f32 %v830_v10  ;;  %v2993_v54 = vmax.f32 %v2979_v31, %v2224_v29  ;;  %v529_v61 = vsub.f32 %v2973_v13, %v2983_v62  ;;  %v902_v33 = vmul.f32 1.442695, %v898_v58 }
 0xe3b   : > { %v1794_v12 = vpop.eup %1793  ;;  %v730_v63 = vadd.f32 %v1792_v35, %v694_v5  ;;  %1805 = vpow2.f32 %v688_v37  ;;  %v541_v15 = vsub.f32 %v2219_v27, %v2983_v62  ;;  %v760_v53 = vmul.f32 1.442695, %v755_v34 }
 0xe3c   : > { %v587_v45 = vadd.f32 %v1794_v12, %v551_v6  ;;  %v1796_v25 = vpop.eup %1795  ;;  %1807 = vpow2.f32 %v866_v38  ;;  %v791_v18 = vsub.f32 %v2385_v14, %v2932_v7  ;;  %v938_v4 = vmul.f32 1.442695, %v934_v48  ;;  %v3013_v38 = vpop.xlane.xlu2 %1541 }
 0xe3d   : > { %v1798_v11 = vpop.eup %1797  ;;  %v766_v41 = vadd.f32 %v1796_v25, %v730_v63  ;;  %1809 = vpow2.f32 %v724_v52  ;;  %v970_v19 = vsub.f32 %v2497_v21, %v2906_v28  ;;  %v528_v35 = vsub.f32 %v2979_v31, %v2993_v54 }
 0xe3e   : > { %v623_v23 = vadd.f32 %v1798_v11, %v587_v45  ;;  %v1800_v60 = vpop.eup %1799  ;;  %v540_v63 = vsub.f32 %v2224_v29, %v2993_v54  ;;  %v536_v27 = vmul.f32 1.442695, %v529_v61  ;;  %1811 = vpow2.f32 %v902_v33 }
 0xe3f   : > { %v1802_v5 = vpop.eup %1801  ;;  %v802_v50 = vadd.f32 %v1800_v60, %v766_v41  ;;  %v548_v47 = vmul.f32 1.442695, %v541_v15  ;;  %1813 = vpow2.f32 %v760_v53  ;;  %v796_v32 = vmul.f32 1.442695, %v791_v18 }
 0xe40   : > { %v659_v24 = vadd.f32 %v1802_v5, %v623_v23  ;;  %v1804_v6 = vpop.eup %1803  ;;  %v827_v14 = vsub.f32 %v2407_v40, %v2932_v7  ;;  %1815 = vpow2.f32 %v938_v4  ;;  %v974_v21 = vmul.f32 1.442695, %v970_v19 }
 0xe41   : > { %v1806_v0 = vpop.eup %1805  ;;  %v838_v12 = vadd.f32 %v1804_v6, %v802_v50  ;;  %v534_v37 = vmul.f32 1.442695, %v528_v35  ;;  %v576_v17 = vsub.f32 %v2251_v44, %v2993_v54  ;;  %v546_v41 = vmul.f32 1.442695, %v540_v63 }
 0xe42   : > { %v695_v10 = vadd.f32 %v1806_v0, %v659_v24  ;;  %v1808_v45 = vpop.eup %1807  ;;  %1817 = vpow2.f32 %v536_v27  ;;  %v577_v29 = vsub.f32 %v2241_v39, %v2983_v62  ;;  %v863_v40 = vsub.f32 %v2431_v3, %v2932_v7 }
 0xe43   : > { %v1810_v25 = vpop.eup %1809  ;;  %v874_v11 = vadd.f32 %v1808_v45, %v838_v12  ;;  %1819 = vpow2.f32 %v548_v47  ;;  %vm1564_vm5 = vcmp.lt.f32.partialorder %v2203_v20, %v3013_v38  ;;  %v832_v23 = vmul.f32 1.442695, %v827_v14 }
 0xe44   : > { %v731_v58 = vadd.f32 %v1810_v25, %v695_v10  ;;  %1821 = vpow2.f32 %v796_v32  ;;  %v1006_v44 = vsub.f32 %v2521_v55, %v2906_v28  ;;  %v1568_v52 = vsel %vm1564_vm5, %v2203_v20, -inf  ;;  %v1812_v34 = vpop.eup %1811 }
 0xe45   : > { %1823 = vpow2.f32 %v974_v21  ;;  %v582_v39 = vmul.f32 1.442695, %v576_v17  ;;  %v612_v60 = vsub.f32 %v2275_v56, %v2993_v54  ;;  %v1576_v48 = vsel %vm509_vm13, %v1568_v52, -inf  ;;  %v1814_v5 = vpop.eup %1813 }
 0xe46   : > { %v910_v3 = vadd.f32 %v1812_v34, %v874_v11  ;;  %1825 = vpow2.f32 %v534_v37  ;;  %v584_v50 = vmul.f32 1.442695, %v577_v29  ;;  %v613_v61 = vsub.f32 %v2265_v51, %v2983_v62  ;;  %1577 = vmax.xlane.f32.xlu0 %v1576_v48  ;;  %v1816_v33 = vpop.eup %1815 }
 0xe47   : > { %1827 = vpow2.f32 %v546_v41  ;;  %v767_v55 = vadd.f32 %v1814_v5, %v731_v58  ;;  %v868_v20 = vmul.f32 1.442695, %v863_v40  ;;  %v899_v15 = vsub.f32 %v2457_v46, %v2932_v7 }
 0xe48   : > { %v1818_v24 = vpop.eup %1817  ;;  %1829 = vpow2.f32 %v832_v23  ;;  %v1010_v56 = vmul.f32 1.442695, %v1006_v44  ;;  %v1042_v53 = vsub.f32 %v2545_v2, %v2906_v28  ;;  %v618_v6 = vmul.f32 1.442695, %v612_v60 }
 0xe49   : > { %v1820_v18 = vpop.eup %1819  ;;  %1831 = vpow2.f32 %v582_v39  ;;  %v648_v51 = vsub.f32 %v2299_v8, %v2993_v54  ;;  %v946_v19 = vadd.f32 %v1816_v33, %v910_v3  ;;  %v620_v35 = vmul.f32 1.442695, %v613_v61  ;;  %v3381_v33 = vld [vmem:[#allocation17_spill] sm:$0xff] }
 0xe4a   : > { %v1822_v4 = vpop.eup %1821  ;;  %1833 = vpow2.f32 %v584_v50  ;;  %v649_v0 = vsub.f32 %v2289_v1, %v2983_v62  ;;  %v904_v63 = vmul.f32 1.442695, %v899_v15  ;;  %v935_v2 = vsub.f32 %v2479_v30, %v2932_v7  ;;  %v3380_v50 = vld [vmem:[#allocation3_spill] sm:$0xff] }
 0xe4b   : > { %v1824_v46 = vpop.eup %1823  ;;  %v803_v12 = vadd.f32 %v1822_v4, %v767_v55  ;;  %1835 = vpow2.f32 %v868_v20  ;;  %v1046_v47 = vmul.f32 1.442695, %v1042_v53  ;;  %v1078_v8 = vsub.f32 %v2569_v42, %v2906_v28 }
 0xe4c   : > { %v1826_v27 = vpop.eup %1825  ;;  %1837 = vpow2.f32 %v1010_v56  ;;  %v654_v32 = vmul.f32 1.442695, %v648_v51  ;;  %v684_v14 = vsub.f32 %v2323_v26, %v2993_v54  ;;  %v553_v1 = vadd.f32 %v1820_v18, %v1818_v24  ;;  %v3382_v18 = vld [vmem:[#allocation2_spill] sm:$0xff] }
 0xe4d   : > { %v1828_v10 = vpop.eup %1827  ;;  %1839 = vpow2.f32 %v618_v6  ;;  %v982_v21 = vadd.f32 %v1824_v46, %v946_v19  ;;  %v656_v37 = vmul.f32 1.442695, %v649_v0  ;;  %v685_v30 = vsub.f32 %v2311_v16, %v2983_v62  ;;  %v3383_v0 = vld [vmem:[#allocation32_spill] sm:$0xff] }
 0xe4e   : > { %v1830_v45 = vpop.eup %1829  ;;  %1841 = vpow2.f32 %v620_v35  ;;  %v940_v11 = vmul.f32 1.442695, %v935_v2  ;;  %v971_v42 = vsub.f32 %v2503_v49, %v2932_v7  ;;  %v1082_v29 = vmul.f32 1.442695, %v1078_v8  ;;  %v3379_v49 = vld [vmem:[#allocation28_spill] sm:$0xff] }
 0xe4f   : > { %v1832_v17 = vpop.eup %1831  ;;  %v839_v25 = vadd.f32 %v1830_v45, %v803_v12  ;;  %1843 = vpow2.f32 %v904_v63  ;;  %v1114_v26 = vsub.f32 %v2593_v9, %v2906_v28  ;;  %v690_v40 = vmul.f32 1.442695, %v684_v14 }
 0xe50   : > { %v1834_v41 = vpop.eup %1833  ;;  %1845 = vpow2.f32 %v1046_v47  ;;  %v720_v23 = vsub.f32 %v2347_v43, %v2993_v54  ;;  %v692_v52 = vmul.f32 1.442695, %v685_v30  ;;  %v721_v34 = vsub.f32 %v2337_v36, %v2983_v62 }
 0xe51   : > { %v1836_v58 = vpop.eup %1835  ;;  %1847 = vpow2.f32 %v654_v32  ;;  %v589_v16 = vadd.f32 %v1834_v41, %v553_v1  ;;  %v1150_v39 = vsub.f32 %v3379_v49, %v2906_v28  ;;  %v976_v9 = vmul.f32 1.442695, %v971_v42  ;;  %v3385_v32 = vld [vmem:[#allocation5_spill] sm:$0xff] }
 0xe52   : > { %v1838_v44 = vpop.eup %1837  ;;  %1849 = vpow2.f32 %v656_v37  ;;  %v875_v48 = vadd.f32 %v1836_v58, %v839_v25  ;;  %v756_v61 = vsub.f32 %v3380_v50, %v2993_v54  ;;  %v1118_v43 = vmul.f32 1.442695, %v1114_v26  ;;  %v3386_v37 = vld [vmem:[#allocation4_spill] sm:$0xff]  ;;  %v3388_v58 = vld [vmem:[#allocation7_spill] sm:$0xff] }
 0xe53   : > { %v1840_v60 = vpop.eup %1839  ;;  %1851 = vpow2.f32 %v940_v11  ;;  %v1018_v5 = vadd.f32 %v1838_v44, %v982_v21  ;;  %v1007_v55 = vsub.f32 %v3381_v33, %v2932_v7  ;;  %v552_v15 = vadd.f32 %v1828_v10, %v1826_v27  ;;  %v3384_v27 = vld [vmem:[#allocation19_spill] sm:$0xff]  ;;  %v3387_v25 = vld [vmem:[#allocation36_spill] sm:$0xff] }
 0xe54   : > { %v1842_v3 = vpop.eup %1841  ;;  %1853 = vpow2.f32 %v1082_v29  ;;  %v726_v36 = vmul.f32 1.442695, %v720_v23  ;;  %v728_v53 = vmul.f32 1.442695, %v721_v34  ;;  %v757_v6 = vsub.f32 %v3382_v18, %v2983_v62  ;;  %v3391_v50 = vld [vmem:[#allocation40_spill] sm:$0xff] }
 0xe55   : > { %v1844_v20 = vpop.eup %1843  ;;  %1855 = vpow2.f32 %v690_v40  ;;  %v625_v24 = vadd.f32 %v1842_v3, %v589_v16  ;;  %v1154_v51 = vmul.f32 1.442695, %v1150_v39  ;;  %v1186_v46 = vsub.f32 %v3383_v0, %v2906_v28  ;;  %v3389_v16 = vld [vmem:[#allocation22_spill] sm:$0xff] }
 0xe56   : > { %v1846_v56 = vpop.eup %1845  ;;  %1857 = vpow2.f32 %v692_v52  ;;  %v911_v19 = vadd.f32 %v1844_v20, %v875_v48  ;;  %v762_v63 = vmul.f32 1.442695, %v756_v61  ;;  %v1012_v2 = vmul.f32 1.442695, %v1007_v55 }
 0xe57   : > { %v1848_v4 = vpop.eup %1847  ;;  %1859 = vpow2.f32 %v976_v9  ;;  %v1054_v35 = vadd.f32 %v1846_v56, %v1018_v5  ;;  %v1043_v47 = vsub.f32 %v3384_v27, %v2932_v7  ;;  %v588_v10 = vadd.f32 %v1832_v17, %v552_v15  ;;  %v3390_v5 = vld [vmem:[#allocation6_spill] sm:$0xff] }
 0xe58   : > { %v1850_v12 = vpop.eup %1849  ;;  %1861 = vpow2.f32 %v1118_v43  ;;  %v792_v14 = vsub.f32 %v3385_v32, %v2993_v54  ;;  %v764_v21 = vmul.f32 1.442695, %v757_v6  ;;  %v793_v30 = vsub.f32 %v3386_v37, %v2983_v62  ;;  %v3393_v56 = vld [vmem:[#allocation26_spill] sm:$0xff] }
 0xe59   : > { %v1852_v8 = vpop.eup %1851  ;;  %1863 = vpow2.f32 %v726_v36  ;;  %v661_v1 = vadd.f32 %v1850_v12, %v625_v24  ;;  %v1222_v11 = vsub.f32 %v3387_v25, %v2906_v28  ;;  %v1190_v26 = vmul.f32 1.442695, %v1186_v46  ;;  %v3394_v46 = vld [vmem:[#allocation8_spill] sm:$0xff] }
 0xe5a   : > { %v1854_v45 = vpop.eup %1853  ;;  %1865 = vpow2.f32 %v728_v53  ;;  %v947_v41 = vadd.f32 %v1852_v8, %v911_v19  ;;  %v828_v40 = vsub.f32 %v3388_v58, %v2993_v54  ;;  %v1048_v23 = vmul.f32 1.442695, %v1043_v47 }
 0xe5b   : > { %v1856_v42 = vpop.eup %1855  ;;  %v1090_v29 = vadd.f32 %v1854_v45, %v1054_v35  ;;  %1867 = vpow2.f32 %v1154_v51  ;;  %v1079_v44 = vsub.f32 %v3389_v16, %v2932_v7  ;;  %v624_v34 = vadd.f32 %v1840_v60, %v588_v10  ;;  %v3392_v60 = vld [vmem:[#allocation9_spill] sm:$0xff]  ;;  %v3399_v16 = vld [vmem:[#allocation48_spill] sm:$0xff] }
 0xe5c   : > { %v1858_v17 = vpop.eup %1857  ;;  %1869 = vpow2.f32 %v1012_v2  ;;  %v798_v49 = vmul.f32 1.442695, %v792_v14  ;;  %v800_v9 = vmul.f32 1.442695, %v793_v30  ;;  %v829_v3 = vsub.f32 %v3390_v5, %v2983_v62  ;;  %v3397_v45 = vld [vmem:[#allocation29_spill] sm:$0xff] }
 0xe5d   : > { %v1860_v52 = vpop.eup %1859  ;;  %1871 = vpow2.f32 %v762_v63  ;;  %v697_v39 = vadd.f32 %v1858_v17, %v661_v1  ;;  %v1258_v61 = vsub.f32 %v3391_v50, %v2906_v28  ;;  %v1226_v20 = vmul.f32 1.442695, %v1222_v11  ;;  %v3395_v63 = vld [vmem:[#allocation44_spill] sm:$0xff] }
 0xe5e   : > { %v1862_v48 = vpop.eup %1861  ;;  %1873 = vpow2.f32 %v764_v21  ;;  %v983_v33 = vadd.f32 %v1860_v52, %v947_v41  ;;  %v864_v36 = vsub.f32 %v3392_v60, %v2993_v54  ;;  %v1084_v24 = vmul.f32 1.442695, %v1079_v44  ;;  %v3403_v60 = vld [vmem:[#allocation52_spill] sm:$0xff] }
 0xe5f   : > { %v1864_v43 = vpop.eup %1863  ;;  %v1126_v55 = vadd.f32 %v1862_v48, %v1090_v29  ;;  %1875 = vpow2.f32 %v1190_v26  ;;  %v1115_v53 = vsub.f32 %v3393_v56, %v2932_v7  ;;  %v660_v6 = vadd.f32 %v1848_v4, %v624_v34  ;;  %v3396_v4 = vld [vmem:[#allocation11_spill] sm:$0xff]  ;;  %v3398_v26 = vld [vmem:[#allocation10_spill] sm:$0xff]  ;;  %v3401_v48 = vld [vmem:[#allocation33_spill] sm:$0xff] }
 0xe60   : > { %v1866_v15 = vpop.eup %1865  ;;  %1877 = vpow2.f32 %v1048_v23  ;;  %v834_v51 = vmul.f32 1.442695, %v828_v40  ;;  %v836_v0 = vmul.f32 1.442695, %v829_v3  ;;  %v865_v12 = vsub.f32 %v3394_v46, %v2983_v62 }
 0xe61   : > { %v1868_v18 = vpop.eup %1867  ;;  %1879 = vpow2.f32 %v798_v49  ;;  %v733_v19 = vadd.f32 %v1866_v15, %v697_v39  ;;  %v1294_v2 = vsub.f32 %v3395_v63, %v2906_v28  ;;  %v1262_v8 = vmul.f32 1.442695, %v1258_v61  ;;  %v3405_v63 = vld [vmem:[#allocation14_spill] sm:$0xff] }
 0xe62   : > { %v1870_v35 = vpop.eup %1869  ;;  %1881 = vpow2.f32 %v800_v9  ;;  %v1162_v47 = vadd.f32 %v1868_v18, %v1126_v55  ;;  %v900_v14 = vsub.f32 %v3396_v4, %v2993_v54  ;;  %v1120_v1 = vmul.f32 1.442695, %v1115_v53 }
 0xe63   : > { %v1872_v27 = vpop.eup %1871  ;;  %1883 = vpow2.f32 %v1226_v20  ;;  %v1019_v10 = vadd.f32 %v1870_v35, %v983_v33  ;;  %v1151_v21 = vsub.f32 %v3397_v45, %v2932_v7  ;;  %v696_v30 = vadd.f32 %v1856_v42, %v660_v6  ;;  %v3400_v42 = vld [vmem:[#allocation13_spill] sm:$0xff]  ;;  %v3402_v20 = vld [vmem:[#allocation12_spill] sm:$0xff] }
 0xe64   : > { %v1874_v32 = vpop.eup %1873  ;;  %1885 = vpow2.f32 %v1084_v24  ;;  %v870_v25 = vmul.f32 1.442695, %v864_v36  ;;  %v872_v29 = vmul.f32 1.442695, %v865_v12  ;;  %v901_v17 = vsub.f32 %v3398_v26, %v2983_v62 }
 0xe65   : > { %v1876_v37 = vpop.eup %1875  ;;  %1887 = vpow2.f32 %v834_v51  ;;  %v769_v11 = vadd.f32 %v1874_v32, %v733_v19  ;;  %v1298_v58 = vmul.f32 1.442695, %v1294_v2  ;;  %v1330_v44 = vsub.f32 %v3399_v16, %v2906_v28  ;;  %v3404_v19 = vld [vmem:[#allocation38_spill] sm:$0xff]  ;;  %v3409_v16 = vld [vmem:[#allocation60_spill] sm:$0xff] }
 0xe66   : > { %v1878_v41 = vpop.eup %1877  ;;  %1889 = vpow2.f32 %v836_v0  ;;  %v1198_v23 = vadd.f32 %v1876_v37, %v1162_v47  ;;  %v936_v49 = vsub.f32 %v3400_v42, %v2993_v54  ;;  %v1156_v39 = vmul.f32 1.442695, %v1151_v21  ;;  %v3407_v37 = vld [vmem:[#allocation15_spill] sm:$0xff] }
 0xe67   : > { %v1880_v40 = vpop.eup %1879  ;;  %1891 = vpow2.f32 %v1262_v8  ;;  %v1055_v52 = vadd.f32 %v1878_v41, %v1019_v10  ;;  %v1187_v9 = vsub.f32 %v3401_v48, %v2932_v7  ;;  %v732_v3 = vadd.f32 %v1864_v43, %v696_v30  ;;  %v3406_v10 = vld [vmem:[#allocation56_spill] sm:$0xff] }
 0xe68   : > { %v1882_v34 = vpop.eup %1881  ;;  %1893 = vpow2.f32 %v1120_v1  ;;  %v906_v50 = vmul.f32 1.442695, %v900_v14  ;;  %v908_v55 = vmul.f32 1.442695, %v901_v17  ;;  %v937_v15 = vsub.f32 %v3402_v20, %v2983_v62 }
 0xe69   : > { %v1884_v5 = vpop.eup %1883  ;;  %1895 = vpow2.f32 %v870_v25  ;;  %v805_v61 = vadd.f32 %v1882_v34, %v769_v11  ;;  %v1366_v36 = vsub.f32 %v3403_v60, %v2906_v28  ;;  %v1334_v53 = vmul.f32 1.442695, %v1330_v44  ;;  %v3408_v25 = vld [vmem:[#allocation41_spill] sm:$0xff] }
 0xe6a   : > { %v1886_v33 = vpop.eup %1885  ;;  %1897 = vpow2.f32 %v872_v29  ;;  %v1234_v56 = vadd.f32 %v1884_v5, %v1198_v23  ;;  %v942_v51 = vmul.f32 1.442695, %v936_v49  ;;  %v1192_v43 = vmul.f32 1.442695, %v1187_v9  ;;  %v3410_v49 = vld [vmem:[#allocation16_spill] sm:$0xff]  ;;  %v3411_v9 = vld [vmem:[#allocation18_spill] sm:$0xff] }
 0xe6b   : > { %v1888_v24 = vpop.eup %1887  ;;  %1899 = vpow2.f32 %v1298_v58  ;;  %v1091_v18 = vadd.f32 %v1886_v33, %v1055_v52  ;;  %v1223_v35 = vsub.f32 %v3404_v19, %v2932_v7  ;;  %v768_v46 = vadd.f32 %v1872_v27, %v732_v3  ;;  %v3412_v3 = vld [vmem:[#allocation45_spill] sm:$0xff] }
 0xe6c   : > { %v1890_v6 = vpop.eup %1889  ;;  %1901 = vpow2.f32 %v1156_v39  ;;  %v973_v2 = vsub.f32 %v3405_v63, %v2983_v62  ;;  %v944_v8 = vmul.f32 1.442695, %v937_v15  ;;  %v1402_v32 = vsub.f32 %v3406_v10, %v2906_v28 }
 0xe6d   : > { %v1892_v0 = vpop.eup %1891  ;;  %1903 = vpow2.f32 %v906_v50  ;;  %v841_v12 = vadd.f32 %v1890_v6, %v805_v61  ;;  %v1370_v1 = vmul.f32 1.442695, %v1366_v36  ;;  %v972_v27 = vsub.f32 %v3407_v37, %v2993_v54  ;;  %v3413_v36 = vld [vmem:[#allocation64_spill] sm:$0xff] }
 0xe6e   : > { %v1894_v47 = vpop.eup %1893  ;;  %1905 = vpow2.f32 %v908_v55  ;;  %v1270_v14 = vadd.f32 %v1892_v0, %v1234_v56  ;;  %v1228_v30 = vmul.f32 1.442695, %v1223_v35  ;;  %v1259_v11 = vsub.f32 %v3408_v25, %v2932_v7 }
 0xe6f   : > { %v1896_v4 = vpop.eup %1895  ;;  %1907 = vpow2.f32 %v1334_v53  ;;  %v1127_v45 = vadd.f32 %v1894_v47, %v1091_v18  ;;  %v804_v29 = vadd.f32 %v1880_v40, %v768_v46  ;;  %v980_v17 = vmul.f32 1.442695, %v973_v2  ;;  %v3415_v46 = vld [vmem:[#allocation50_spill] sm:$0xff] }
 0xe70   : > { %v1898_v21 = vpop.eup %1897  ;;  %1909 = vpow2.f32 %v1192_v43  ;;  %v1406_v23 = vmul.f32 1.442695, %v1402_v32  ;;  %v1438_v44 = vsub.f32 %v3409_v16, %v2906_v28  ;;  %v1009_v39 = vsub.f32 %v3410_v49, %v2983_v62  ;;  %v3414_v43 = vld [vmem:[#allocation20_spill] sm:$0xff] }
 0xe71   : > { %v1900_v41 = vpop.eup %1899  ;;  %1911 = vpow2.f32 %v942_v51  ;;  %v877_v26 = vadd.f32 %v1898_v21, %v841_v12  ;;  %v1008_v40 = vsub.f32 %v3411_v9, %v2993_v54  ;;  %v1264_v5 = vmul.f32 1.442695, %v1259_v11  ;;  %v3418_v11 = vld [vmem:[#allocation21_spill] sm:$0xff] }
 0xe72   : > { %v1902_v58 = vpop.eup %1901  ;;  %1913 = vpow2.f32 %v944_v8  ;;  %v1306_v34 = vadd.f32 %v1900_v41, %v1270_v14  ;;  %v1295_v50 = vsub.f32 %v3412_v3, %v2932_v7  ;;  %v840_v33 = vadd.f32 %v1888_v24, %v804_v29  ;;  %v3416_v14 = vld [vmem:[#allocation53_spill] sm:$0xff] }
 0xe73   : > { %v1904_v52 = vpop.eup %1903  ;;  %1915 = vpow2.f32 %v1370_v1  ;;  %v1163_v42 = vadd.f32 %v1902_v58, %v1127_v45  ;;  %v978_v55 = vmul.f32 1.442695, %v972_v27  ;;  %v1442_v60 = vmul.f32 1.442695, %v1438_v44  ;;  %v3417_v45 = vld [vmem:[#allocation23_spill] sm:$0xff]  ;;  %v3419_v44 = vld [vmem:[#allocation57_spill] sm:$0xff] }
 0xe74   : > { %v1906_v48 = vpop.eup %1905  ;;  %1917 = vpow2.f32 %v1228_v30  ;;  %v1474_v56 = vsub.f32 %v3413_v36, %v2906_v28  ;;  %v1016_v51 = vmul.f32 1.442695, %v1009_v39  ;;  %v1045_v19 = vsub.f32 %v3414_v43, %v2983_v62 }
 0xe75   : > { %v1908_v61 = vpop.eup %1907  ;;  %v913_v20 = vadd.f32 %v1906_v48, %v877_v26  ;;  %1919 = vpow2.f32 %v980_v17  ;;  %v1014_v0 = vmul.f32 1.442695, %v1008_v40  ;;  %v1300_v24 = vmul.f32 1.442695, %v1295_v50 }
 0xe76   : > { %v1910_v15 = vpop.eup %1909  ;;  %1921 = vpow2.f32 %v1406_v23  ;;  %v1342_v18 = vadd.f32 %v1908_v61, %v1306_v34  ;;  %v1331_v12 = vsub.f32 %v3415_v46, %v2932_v7  ;;  %v876_v2 = vadd.f32 %v1896_v4, %v840_v33  ;;  %v3421_v61 = vld [vmem:[#allocation24_spill] sm:$0xff] }
 0xe77   : > { %v1912_v53 = vpop.eup %1911  ;;  %v1199_v6 = vadd.f32 %v1910_v15, %v1163_v42  ;;  %1923 = vpow2.f32 %v1264_v5  ;;  %v1510_v8 = vsub.f32 %v2870_v57, %v2906_v28  ;;  %v1478_v32 = vmul.f32 1.442695, %v1474_v56  ;;  %v3420_v42 = vld [vmem:[#allocation25_spill] sm:$0xff] }
 0xe78   : > { %v1914_v35 = vpop.eup %1913  ;;  %1925 = vpow2.f32 %v978_v55  ;;  %v1367_v1 = vsub.f32 %v3416_v14, %v2932_v7  ;;  %v1081_v21 = vsub.f32 %v3417_v45, %v2983_v62  ;;  %v1052_v25 = vmul.f32 1.442695, %v1045_v19 }
 0xe79   : > { %v1916_v63 = vpop.eup %1915  ;;  %v949_v47 = vadd.f32 %v1914_v35, %v913_v20  ;;  %1927 = vpow2.f32 %v1442_v60  ;;  %v1044_v41 = vsub.f32 %v3418_v11, %v2993_v54  ;;  %v1546_v57 = vsub.f32 %v2910_v22, %v2906_v28  ;;  %v3422_v60 = vld [vmem:[#allocation30_spill] sm:$0xff]  ;;  %v3427_v11 = vld [vmem:[#allocation65_spill] sm:$0xff] }
 0xe7a   : > { %v1918_v10 = vpop.eup %1917  ;;  %v1378_v27 = vadd.f32 %v1916_v63, %v1342_v18  ;;  %1929 = vpow2.f32 %v1016_v51  ;;  %v1336_v29 = vmul.f32 1.442695, %v1331_v12  ;;  %v912_v26 = vadd.f32 %v1904_v52, %v876_v2 }
 0xe7b   : > { %v1920_v37 = vpop.eup %1919  ;;  %v1235_v30 = vadd.f32 %v1918_v10, %v1199_v6  ;;  %1931 = vpow2.f32 %v1300_v24  ;;  %v1514_v58 = vmul.f32 1.442695, %v1510_v8  ;;  %v1372_v16 = vmul.f32 1.442695, %v1367_v1 }
 0xe7c   : > { %v1922_v4 = vpop.eup %1921  ;;  %1933 = vpow2.f32 %v1014_v0  ;;  %v985_v17 = vadd.f32 %v1920_v37, %v949_v47  ;;  %v1403_v34 = vsub.f32 %v3419_v44, %v2932_v7  ;;  %v1117_v49 = vsub.f32 %v3420_v42, %v2983_v62  ;;  %v3424_v0 = vld [vmem:[#allocation62_spill] sm:$0xff]  ;;  %v3425_v47 = vld [vmem:[#allocation31_spill] sm:$0xff] }
 0xe7d   : > { %v1924_v23 = vpop.eup %1923  ;;  %1935 = vpow2.f32 %v1478_v32  ;;  %v1414_v48 = vadd.f32 %v1922_v4, %v1378_v27  ;;  %v1088_v22 = vmul.f32 1.442695, %v1081_v21  ;;  %v1550_v5 = vmul.f32 1.442695, %v1546_v57  ;;  %v3426_v27 = vld [vmem:[#allocation34_spill] sm:$0xff] }
 0xe7e   : > { %v1926_v39 = vpop.eup %1925  ;;  %v1271_v9 = vadd.f32 %v1924_v23, %v1235_v30  ;;  %1937 = vpow2.f32 %v1052_v25  ;;  %v948_v3 = vadd.f32 %v1912_v53, %v912_v26  ;;  %v1050_v50 = vmul.f32 1.442695, %v1044_v41  ;;  %v3423_v53 = vld [vmem:[#allocation27_spill] sm:$0xff]  ;;  %v3428_v23 = vld [vmem:[#allocation68_spill] sm:$0xff] }
 0xe7f   : > { %v1928_v40 = vpop.eup %1927  ;;  %1939 = vpow2.f32 %v1336_v29  ;;  %v1080_v33 = vsub.f32 %v3421_v61, %v2993_v54  ;;  %v1408_v20 = vmul.f32 1.442695, %v1403_v34  ;;  %v1153_v36 = vsub.f32 %v3422_v60, %v2983_v62  ;;  %v3429_v34 = vld [vmem:[#allocation37_spill] sm:$0xff]  ;;  %v3431_v60 = vld [vmem:[#allocation42_spill] sm:$0xff] }
 0xe80   : > { %v1930_v52 = vpop.eup %1929  ;;  %1941 = vpow2.f32 %v1514_v58  ;;  %v1450_v18 = vadd.f32 %v1928_v40, %v1414_v48  ;;  %v1124_v51 = vmul.f32 1.442695, %v1117_v49  ;;  %v1116_v35 = vsub.f32 %v3423_v53, %v2993_v54  ;;  %v3432_v53 = vld [vmem:[#allocation39_spill] sm:$0xff] }
 0xe81   : > { %v1932_v55 = vpop.eup %1931  ;;  %1943 = vpow2.f32 %v1372_v16  ;;  %v1021_v15 = vadd.f32 %v1930_v52, %v985_v17  ;;  %v1439_v24 = vsub.f32 %v3424_v0, %v2932_v7  ;;  %v984_v63 = vadd.f32 %v1926_v39, %v948_v3 }
 0xe82   : > { %v1934_v56 = vpop.eup %1933  ;;  %v1307_v6 = vadd.f32 %v1932_v55, %v1271_v9  ;;  %1945 = vpow2.f32 %v1088_v22  ;;  %v1086_v2 = vmul.f32 1.442695, %v1080_v33  ;;  %v1152_v8 = vsub.f32 %v3425_v47, %v2993_v54  ;;  %v3433_v47 = vld [vmem:[#allocation46_spill] sm:$0xff] }
 0xe83   : > { %v1936_v19 = vpop.eup %1935  ;;  %1947 = vpow2.f32 %v1550_v5  ;;  %v1160_v14 = vmul.f32 1.442695, %v1153_v36  ;;  %v1189_v30 = vsub.f32 %v3426_v27, %v2983_v62  ;;  %v1444_v4 = vmul.f32 1.442695, %v1439_v24 }
 0xe84   : > { %v1938_v12 = vpop.eup %1937  ;;  %1949 = vpow2.f32 %v1050_v50  ;;  %v1486_v21 = vadd.f32 %v1936_v19, %v1450_v18  ;;  %v1475_v41 = vsub.f32 %v3427_v11, %v2932_v7  ;;  %v1020_v29 = vadd.f32 %v1934_v56, %v984_v63  ;;  %v3430_v50 = vld [vmem:[#allocation35_spill] sm:$0xff] }
 0xe85   : > { %v1940_v10 = vpop.eup %1939  ;;  %1951 = vpow2.f32 %v1408_v20  ;;  %v1057_v32 = vadd.f32 %v1938_v12, %v1021_v15  ;;  %v1122_v26 = vmul.f32 1.442695, %v1116_v35  ;;  %v1158_v17 = vmul.f32 1.442695, %v1152_v8 }
 0xe86   : > { %v1942_v45 = vpop.eup %1941  ;;  %v1343_v37 = vadd.f32 %v1940_v10, %v1307_v6  ;;  %1953 = vpow2.f32 %v1124_v51  ;;  %v1511_v16 = vsub.f32 %v3428_v23, %v2932_v7  ;;  %v1225_v42 = vsub.f32 %v3429_v34, %v2983_v62  ;;  %v3436_v34 = vld [vmem:[#allocation47_spill] sm:$0xff] }
 0xe87   : > { %v1944_v25 = vpop.eup %1943  ;;  %v1522_v39 = vadd.f32 %v1942_v45, %v1486_v21  ;;  %v1196_v9 = vmul.f32 1.442695, %v1189_v30  ;;  %v1480_v40 = vmul.f32 1.442695, %v1475_v41  ;;  %v1547_v5 = vsub.f32 %v2928_v59, %v2932_v7 }
 0xe88   : > { %v1946_v57 = vpop.eup %1945  ;;  %v1379_v48 = vadd.f32 %v1944_v25, %v1343_v37  ;;  %v1188_v61 = vsub.f32 %v3430_v50, %v2993_v54  ;;  %v1516_v20 = vmul.f32 1.442695, %v1511_v16  ;;  %v1261_v36 = vsub.f32 %v3431_v60, %v2983_v62  ;;  %v3434_v37 = vld [vmem:[#allocation43_spill] sm:$0xff] }
 0xe89   : > { %v1948_v58 = vpop.eup %1947  ;;  %v1093_v44 = vadd.f32 %v1946_v57, %v1057_v32  ;;  %v1232_v18 = vmul.f32 1.442695, %v1225_v42  ;;  %v1552_v59 = vmul.f32 1.442695, %v1547_v5  ;;  %v1224_v35 = vsub.f32 %v3432_v53, %v2993_v54 }
 0xe8a   : > { %v1950_v49 = vpop.eup %1949  ;;  %v1558_v33 = vadd.f32 %v1948_v58, %v1522_v39  ;;  %v1194_v24 = vmul.f32 1.442695, %v1188_v61  ;;  %v1297_v8 = vsub.f32 %v3433_v47, %v2983_v62  ;;  %v1260_v27 = vsub.f32 %v3434_v37, %v2993_v54  ;;  %v3444_v37 = vld [vmem:[#allocation66_spill] sm:$0xff] }
 0xe8b   : > { %v1952_v22 = vpop.eup %1951  ;;  %v1056_v3 = vadd.f32 %v1950_v49, %v1020_v29  ;;  %v1230_v21 = vmul.f32 1.442695, %v1224_v35  ;;  %v1296_v42 = vsub.f32 %v3436_v34, %v2993_v54  ;;  %vm1614_vm13 = vcmask 7168   ;;  %v3441_v35 = vld [vmem:[#allocation55_spill] sm:$0xff]  ;;  %v3447_v34 = vld [vmem:[#allocation73_spill] sm:$0xff] }
 0xe8c   : > { %v1954_v52 = vpop.eup %1953  ;;  %v1415_v56 = vadd.f32 %v1952_v22, %v1379_v48 }
 0xe8d   : > { %v1129_v15 = vadd.f32 %v1954_v52, %v1093_v44  ;;  %v1266_v44 = vmul.f32 1.442695, %v1260_v27  ;;  %v1477_v27 = vsub.f32 %v3444_v37, %v2983_v62 }
 0xe9d   : > { %v1572_v43 = vpop.xlane.xlu1 %1571 }
 0xe9e   : > { %v1582_v46 = vsub.f32 %v1572_v43, %v2906_v28 }
 0xea0   : > { %v1586_v1 = vmul.f32 1.442695, %v1582_v46 }
 0xea2   : > { %1955 = vpow2.f32 %v1586_v1 }
 0xea3   : > { %1957 = vpow2.f32 %v1086_v2  ;;  %v1268_v2 = vmul.f32 1.442695, %v1261_v36 }
 0xea4   : > { %1959 = vpow2.f32 %v1160_v14 }
 0xea5   : > { %1961 = vpow2.f32 %v1444_v4  ;;  %v1575_v10 = vpop.xlane.xlu2 %1574  ;;  %v3435_v4 = vld [vmem:[#allocation49_spill] sm:$0xff] }
 0xea6   : > { %1963 = vpow2.f32 %v1122_v26  ;;  %v1583_v14 = vsub.f32 %v1575_v10, %v2932_v7  ;;  %v1333_v11 = vsub.f32 %v3435_v4, %v2983_v62  ;;  %v1304_v26 = vmul.f32 1.442695, %v1297_v8  ;;  %v3443_v10 = vld [vmem:[#allocation59_spill] sm:$0xff] }
 0xea7   : > { %1965 = vpow2.f32 %v1158_v17 }
 0xea8   : > { %v1956_v55 = vpop.eup %1955  ;;  %1967 = vpow2.f32 %v1196_v9  ;;  %v1588_v41 = vmul.f32 1.442695, %v1583_v14  ;;  %v1340_v48 = vmul.f32 1.442695, %v1333_v11 }
 0xea9   : > { %v1594_v6 = vadd.f32 %v1956_v55, %v1558_v33  ;;  %v1958_v51 = vpop.eup %1957  ;;  %1969 = vpow2.f32 %v1480_v40  ;;  %v3437_v40 = vld [vmem:[#allocation54_spill] sm:$0xff] }
 0xeaa   : > { %v1960_v43 = vpop.eup %1959  ;;  %v1092_v19 = vadd.f32 %v1958_v51, %v1056_v3  ;;  %v1369_v5 = vsub.f32 %v3437_v40, %v2983_v62  ;;  %v3438_v3 = vld [vmem:[#allocation71_spill] sm:$0xff] }
 0xeab   : > { %1971 = vlog2.f32 %v1594_v6  ;;  %v1962_v0 = vpop.eup %1961  ;;  %v1165_v46 = vadd.f32 %v1960_v43, %v1129_v15  ;;  %v3439_v15 = vld [vmem:[#allocation51_spill] sm:$0xff] }
 0xeac   : > { %1973 = vpow2.f32 %v1516_v20  ;;  %v1964_v12 = vpop.eup %1963  ;;  %v1451_v63 = vadd.f32 %v1962_v0, %v1415_v56  ;;  %v1332_v60 = vsub.f32 %v3439_v15, %v2993_v54  ;;  %v1376_v56 = vmul.f32 1.442695, %v1369_v5 }
 0xead   : > { %1975 = vpow2.f32 %v1232_v18  ;;  %v1966_v32 = vpop.eup %1965  ;;  %v1128_v45 = vadd.f32 %v1964_v12, %v1092_v19  ;;  %v3440_v18 = vld [vmem:[#allocation58_spill] sm:$0xff]  ;;  %v1368_v0 = vsub.f32 %v3441_v35, %v2993_v54  ;;  %v3442_v12 = vld [vmem:[#allocation61_spill] sm:$0xff] }
 0xeae   : > { %1977 = vpow2.f32 %v1552_v59  ;;  %v1968_v1 = vpop.eup %1967  ;;  %v1405_v6 = vsub.f32 %v3440_v18, %v2983_v62  ;;  %v1338_v53 = vmul.f32 1.442695, %v1332_v60  ;;  %v1548_v18 = vsub.f32 %v3013_v38, %v2993_v54 }
 0xeaf   : > { %v1970_v30 = vpop.eup %1969  ;;  %1979 = vpow2.f32 %v1194_v24  ;;  %v1201_v25 = vadd.f32 %v1968_v1, %v1165_v46  ;;  %v1164_v16 = vadd.f32 %v1966_v32, %v1128_v45  ;;  %v1404_v32 = vsub.f32 %v3443_v10, %v2993_v54 }
 0xeb0   : > { %v1487_v29 = vadd.f32 %v1970_v30, %v1451_v63  ;;  %1981 = vpow2.f32 %v1268_v2  ;;  %v1412_v46 = vmul.f32 1.442695, %v1405_v6  ;;  %v1441_v63 = vsub.f32 %v3442_v12, %v2983_v62 }
 0xeb1   : > { %v1972_v57 = vpop.eup %1971  ;;  %1983 = vpow2.f32 %v1588_v41  ;;  %v1374_v14 = vmul.f32 1.442695, %v1368_v0  ;;  %v1410_v41 = vmul.f32 1.442695, %v1404_v32 }
 0xeb2   : > { %v1974_v17 = vpop.eup %1973  ;;  %v1599_v58 = vmul.f32 0.6931472, %v1972_v57  ;;  %1985 = vpow2.f32 %v1230_v21  ;;  %v1448_v21 = vmul.f32 1.442695, %v1441_v63  ;;  %v3445_v57 = vld [vmem:[#allocation63_spill] sm:$0xff] }
 0xeb3   : > { %v1976_v23 = vpop.eup %1975  ;;  %v1523_v22 = vadd.f32 %v1974_v17, %v1487_v29  ;;  %1987 = vpow2.f32 %v1304_v26  ;;  %v1440_v29 = vsub.f32 %v3445_v57, %v2993_v54  ;;  %v3446_v17 = vld [vmem:[#allocation69_spill] sm:$0xff] }
 0xeb4   : > { %v1978_v49 = vpop.eup %1977  ;;  %v1237_v39 = vadd.f32 %v1976_v23, %v1201_v25  ;;  %v1606_v9 = vadd.f32 %v1599_v58, %v2906_v28  ;;  %1989 = vpow2.f32 %v1266_v44  ;;  %v1302_v28 = vmul.f32 1.442695, %v1296_v42 }
 0xeb5   : > { %v1980_v52 = vpop.eup %1979  ;;  %v1559_v55 = vadd.f32 %v1978_v49, %v1523_v22  ;;  %1991 = vpow2.f32 %v1340_v48  ;;  %v1513_v58 = vsub.f32 %v3446_v17, %v2983_v62  ;;  %v1484_v44 = vmul.f32 1.442695, %v1477_v27 }
 0xeb6   : > { %v1610_v50 = vsub.f32 %v1606_v9, %v3438_v3  ;;  %v1982_v61 = vpop.eup %1981  ;;  %v1200_v33 = vadd.f32 %v1980_v52, %v1164_v16  ;;  %v1581_v16 = vpop.xlane.xlu1 %1580  ;;  %v1549_v42 = vsub.f32 %v3447_v34, %v2983_v62  ;;  %v1446_v40 = vmul.f32 1.442695, %v1440_v29  ;;  %v3449_v52 = vld [vmem:[#allocation67_spill] sm:$0xff] }
 0xeb7   : > { %v1984_v20 = vpop.eup %1983  ;;  %v1273_v36 = vadd.f32 %v1982_v61, %v1237_v39  ;;  %v3448_v39 = vld [vmem:[#allocation72_spill] sm:$0xff]  ;;  %v1585_v5 = vsub.f32 %v1581_v16, %v2983_v62  ;;  %v1476_v3 = vsub.f32 %v3449_v52, %v2993_v54 }
 0xeb8   : > { %1615 = vst.msk [vmem:[%s3180_s14] sm:$0xff] %vm1614_vm13, %v1610_v50  ;;  %v1595_v51 = vadd.f32 %v1984_v20, %v1559_v55  ;;  %v1986_v59 = vpop.eup %1985  ;;  %v1556_v61 = vmul.f32 1.442695, %v1549_v42 }
 0xeb9   : > { %v1988_v43 = vpop.eup %1987  ;;  %v1236_v19 = vadd.f32 %v1986_v59, %v1200_v33  ;;  %v1592_v60 = vmul.f32 1.442695, %v1585_v5  ;;  %v1578_v12 = vpop.xlane.xlu0 %1577 }
 0xeba   : > { %1993 = vlog2.f32 %v1595_v51  ;;  %v1309_v24 = vadd.f32 %v1988_v43, %v1273_v36  ;;  %v1990_v2 = vpop.eup %1989  ;;  %v1482_v36 = vmul.f32 1.442695, %v1476_v3 }
 0xebb   : > { %1995 = vpow2.f32 %v1302_v28  ;;  %v1992_v47 = vpop.eup %1991  ;;  %v1272_v8 = vadd.f32 %v1990_v2, %v1236_v19  ;;  %v3450_v28 = vld [vmem:[#allocation70_spill] sm:$0xff]  ;;  %v1584_v2 = vsub.f32 %v1578_v12, %v2993_v54 }
 0xebc   : > { %1997 = vpow2.f32 %v1376_v56  ;;  %v1345_v1 = vadd.f32 %v1992_v47, %v1309_v24  ;;  %v1512_v15 = vsub.f32 %v3450_v28, %v2993_v54 }
 0xebd   : > { %1999 = vpow2.f32 %v1338_v53  ;;  %v1554_v53 = vmul.f32 1.442695, %v1548_v18  ;;  %v1590_v10 = vmul.f32 1.442695, %v1584_v2 }
 0xebe   : > { %2001 = vpow2.f32 %v1412_v46  ;;  %v1518_v43 = vmul.f32 1.442695, %v1512_v15 }
 0xebf   : > { %2003 = vpow2.f32 %v1374_v14 }
 0xec0   : > { %v1994_v45 = vpop.eup %1993  ;;  %2005 = vpow2.f32 %v1448_v21 }
 0xec1   : > { %v1996_v30 = vpop.eup %1995  ;;  %v1601_v25 = vmul.f32 0.6931472, %v1994_v45  ;;  %2007 = vpow2.f32 %v1410_v41 }
 0xec2   : > { %v1998_v4 = vpop.eup %1997  ;;  %v1308_v11 = vadd.f32 %v1996_v30, %v1272_v8  ;;  %2009 = vpow2.f32 %v1484_v44 }
 0xec3   : > { %v1381_v26 = vadd.f32 %v1998_v4, %v1345_v1  ;;  %v1607_v23 = vadd.f32 %v1601_v25, %v2932_v7  ;;  %v2000_v49 = vpop.eup %1999  ;;  %v1520_v7 = vmul.f32 1.442695, %v1513_v58  ;;  %2011 = vpow2.f32 %v1446_v40 }
 0xec4   : > { %v2002_v9 = vpop.eup %2001  ;;  %v1344_v22 = vadd.f32 %v2000_v49, %v1308_v11 }
 0xec5   : > { %v1611_v48 = vsub.f32 %v1607_v23, %v3448_v39  ;;  %v1417_v50 = vadd.f32 %v2002_v9, %v1381_v26  ;;  %v2004_v33 = vpop.eup %2003  ;;  %2013 = vpow2.f32 %v1520_v7 }
 0xec6   : > { %v2006_v55 = vpop.eup %2005  ;;  %v1380_v20 = vadd.f32 %v2004_v33, %v1344_v22  ;;  %2015 = vpow2.f32 %v1556_v61 }
 0xec7   : > { %1616 = vst.msk [vmem:[%s3180_s14 + $0x8] sm:$0xff] %vm1614_vm13, %v1611_v48  ;;  %v1453_v56 = vadd.f32 %v2006_v55, %v1417_v50  ;;  %v2008_v6 = vpop.eup %2007  ;;  %2017 = vpow2.f32 %v1592_v60 }
 0xec8   : > { %v2010_v51 = vpop.eup %2009  ;;  %v1416_v59 = vadd.f32 %v2008_v6, %v1380_v20  ;;  %2019 = vpow2.f32 %v1482_v36 }
 0xec9   : > { %v1489_v19 = vadd.f32 %v2010_v51, %v1453_v56  ;;  %v2012_v35 = vpop.eup %2011  ;;  %2021 = vpow2.f32 %v1518_v43 }
 0xeca   : > { %v1452_v46 = vadd.f32 %v2012_v35, %v1416_v59  ;;  %2023 = vpow2.f32 %v1554_v53 }
 0xecb   : > { %v2014_v0 = vpop.eup %2013  ;;  %2025 = vpow2.f32 %v1590_v10 }
 0xecc   : > { %v2016_v24 = vpop.eup %2015  ;;  %v1525_v63 = vadd.f32 %v2014_v0, %v1489_v19 }
 0xecd   : > { %v2018_v38 = vpop.eup %2017 }
 0xece   : > { %v2020_v47 = vpop.eup %2019  ;;  %v1561_v8 = vadd.f32 %v2016_v24, %v1525_v63 }
 0xecf   : > { %v1488_v32 = vadd.f32 %v2020_v47, %v1452_v46  ;;  %v2022_v1 = vpop.eup %2021 }
 0xed0   : > { %v1597_v14 = vadd.f32 %v2018_v38, %v1561_v8  ;;  %v2024_v45 = vpop.eup %2023 }
 0xed1   : > { %v1524_v21 = vadd.f32 %v2022_v1, %v1488_v32  ;;  %v2026_v27 = vpop.eup %2025 }
 0xed2   : > { %2027 = vlog2.f32 %v1597_v14 }
 0xed3   : > { %v1560_v37 = vadd.f32 %v2024_v45, %v1524_v21 }
 0xed5   : > { %v1596_v30 = vadd.f32 %v2026_v27, %v1560_v37 }
 0xed7   : > { %2029 = vlog2.f32 %v1596_v30 }
 0xed8   : > { %v2028_v25 = vpop.eup %2027 }
 0xed9   : > { %v1605_v4 = vmul.f32 0.6931472, %v2028_v25 }
 0xedb   : > { %v1609_v57 = vadd.f32 %v1605_v4, %v2983_v62 }
 0xedd   : > { %v2030_v11 = vpop.eup %2029  ;;  %v1613_v17 = vsub.f32 %v1609_v57, %v2973_v13 }
 0xede   : > { %v1603_v41 = vmul.f32 0.6931472, %v2030_v11 }
 0xedf   : > { %1618 = vst.msk [vmem:[%s3180_s14 + $0x18] sm:$0xff] %vm1614_vm13, %v1613_v17 }
 0xee0   : > { %v1608_v29 = vadd.f32 %v1603_v41, %v2993_v54 }
 0xee2   : > { %v1612_v26 = vsub.f32 %v1608_v29, %v2979_v31 }
 0xee4   : > { %1617 = vst.msk [vmem:[%s3180_s14 + $0x10] sm:$0xff] %vm1614_vm13, %v1612_v26 }
 0xee5 PF: > { %s16_s21 = sadd.s32 1, %s2041_s21  }
 0xee6   : > { %p13_p4 = scmp.ge.s32.totalorder %s16_s21, 4  }
 0xee8   :  { %15 = sbr.rel (!%p13_p4) target bundleno = 1 (0x1), region = 81 }

</bundles_post_ra>
